<compile_context>
chip_gen: v6e
topology: v6e:2x2x1
jax: 0.10.0
libtpu: 0.0.40
codegen_flags: <defaults>
</compile_context>

<pallas_src>
import jax
import jax.numpy as jnp
from jax import lax
from jax.experimental import pallas as pl
from jax.experimental.pallas import tpu as pltpu

LN_EPS = 1e-5  # torch.nn.LayerNorm default


def _round_up(x, m):
    return ((x + m - 1) // m) * m


def fusion_kernel(v_ref, t_ref, wv_ref, wt_ref, bias_ref, o_ref):
    # Activations arrive in bf16; upcast once for f32 LN math (v5e-friendly).
    v = v_ref[...].astype(jnp.float32)        # (TB, Dv)
    t = t_ref[...].astype(jnp.float32)        # (TB, Dt)
    d_total = v.shape[-1] + t.shape[-1]       # static 1536
    inv_d = 1.0 / float(d_total)

    # One-pass LayerNorm stats over the (virtual) concat [v, t].
    # NOTE: E[x^2] - mean^2 in f32 is fine for typical feature scales; a
    # two-pass / Welford fallback would be safer for poorly scaled inputs.
    s = (jnp.sum(v, axis=-1, keepdims=True)
         + jnp.sum(t, axis=-1, keepdims=True))
    ss = (jnp.sum(v * v, axis=-1, keepdims=True)
          + jnp.sum(t * t, axis=-1, keepdims=True))
    mean = s * inv_d
    var = ss * inv_d - mean * mean            # biased variance (matches torch)
    inv_std = lax.rsqrt(var + LN_EPS)

    # Gamma/beta are folded into wv/wt/bias in the wrapper, so the normalize
    # is just (x - mean) * inv_std.  Cast to bf16 only at the MXU operands.
    xn_v = ((v - mean) * inv_std).astype(jnp.bfloat16)
    xn_t = ((t - mean) * inv_std).astype(jnp.bfloat16)

    # Linear(1536 -> 512) as two K-sliced bf16 MXU matmuls, f32 accumulate.
    y = jnp.dot(xn_v, wv_ref[...], preferred_element_type=jnp.float32)
    y = y + jnp.dot(xn_t, wt_ref[...], preferred_element_type=jnp.float32)
    y = y + bias_ref[...]

    # ReLU; Dropout(0.5) is identity in eval mode.
    # TODO(synk): training-mode dropout would use pltpu.prng_seed +
    # pltpu.prng_random_bits to build the keep-mask and scale by 1/(1-p).
    o_ref[...] = jnp.maximum(y, 0.0).astype(o_ref.dtype)


def prepare_fusion_params(gamma, beta, w, b, dv):
    """Fold the LayerNorm affine into the linear params and pre-split/cast the
    weight.  Call ONCE (or keep as jit constants); not per forward call.

    gamma/beta: (1, D) f32;  w: (D, Dout) f32 (transposed vs torch (Dout, Din));
    b: (1, Dout) f32;  dv = visual feature width.
    Returns (wv_bf16 (Dv,Dout), wt_bf16 (Dt,Dout), bias_f32 (1,Dout)).
    """
    w_fold = gamma.reshape(-1, 1).astype(jnp.float32) * w.astype(jnp.float32)
    b_fold = beta.astype(jnp.float32) @ w.astype(jnp.float32) + b.astype(jnp.float32)
    wv = w_fold[:dv, :].astype(jnp.bfloat16)   # bf16 weights: half the HBM traffic
    wt = w_fold[dv:, :].astype(jnp.bfloat16)
    return wv, wt, b_fold


def fusion_forward(visual, text, wv, wt, bias, *, tb=512, out_dtype=jnp.float32):
    """visual: (B, Dv), text: (B, Dt) — f32 or (preferably) bf16.
    wv/wt/bias come from prepare_fusion_params.  Returns (B, Dout)."""
    B, Dv = visual.shape
    Bt, Dt = text.shape
    assert Bt == B
    assert wv.shape[0] == Dv and wt.shape[0] == Dt
    Dout = wv.shape[1]
    assert wt.shape[1] == Dout and bias.shape == (1, Dout)

    # Stream activations in bf16 (kernel is HBM-bound at realistic batch sizes).
    # Callers that already hold bf16 features avoid this extra cast pass.
    if visual.dtype != jnp.bfloat16:
        visual = visual.astype(jnp.bfloat16)
    if text.dtype != jnp.bfloat16:
        text = text.astype(jnp.bfloat16)

    # Batch tile: multiple of 8 sublanes; no wrapper-side padding — the ragged
    # last block (if any) is handled by Pallas and is row-local.
    TB = min(tb, _round_up(B, 8))
    nb = pl.cdiv(B, TB)

    out = pl.pallas_call(
        fusion_kernel,
        out_shape=jax.ShapeDtypeStruct((B, Dout), out_dtype),
        grid_spec=pltpu.PrefetchScalarGridSpec(
            num_scalar_prefetch=0,
            grid=(nb,),
            in_specs=[
                pl.BlockSpec((TB, Dv), lambda i: (i, 0)),     # visual rows (bf16)
                pl.BlockSpec((TB, Dt), lambda i: (i, 0)),     # text rows  (bf16)
                pl.BlockSpec((Dv, Dout), lambda i: (0, 0)),   # folded w_v (bf16, resident)
                pl.BlockSpec((Dt, Dout), lambda i: (0, 0)),   # folded w_t (bf16, resident)
                pl.BlockSpec((1, Dout), lambda i: (0, 0)),    # folded bias (f32)
            ],
            out_specs=pl.BlockSpec((TB, Dout), lambda i: (i, 0)),
        ),
        # Batch rows are independent: "parallel" lets v7x shard the grid across
        # its two TensorCores; measured-neutral on single-TC v5e/v6e.
        compiler_params=pltpu.CompilerParams(
            dimension_semantics=("parallel",),
            vmem_limit_bytes=48 * 1024 * 1024),
    )(visual, text, wv, wt, bias)

    return out


def fusion_reference(visual, text, gamma, beta, w, b):
    """Exact f32 reference of the PyTorch forward (eval mode)."""
    x = jnp.concatenate([visual, text], axis=1).astype(jnp.float32)
    mean = jnp.mean(x, axis=-1, keepdims=True)
    var = jnp.mean((x - mean) ** 2, axis=-1, keepdims=True)
    xn = (x - mean) / jnp.sqrt(var + LN_EPS) * gamma + beta
    y = xn @ w + b
    return jnp.maximum(y, 0.0)


if __name__ == "__main__":
    # Module-consistent dims: visual (PCA) = 768, text (BERT) = 768,
    # fusion hidden = 512.  Small batch.
    B, DV, DT, DOUT = 8, 768, 768, 512
    D = DV + DT

    key = jax.random.PRNGKey(0)
    kv, kt, kw, kb, kg, kbe = jax.random.split(key, 6)

    visual = jax.random.normal(kv, (B, DV), dtype=jnp.float32)
    text = jax.random.normal(kt, (B, DT), dtype=jnp.float32)

    # LayerNorm(1536) with non-trivial (trained-like) affine so the fold is tested.
    gamma = 1.0 + 0.1 * jax.random.normal(kg, (1, D), dtype=jnp.float32)
    beta = 0.1 * jax.random.normal(kbe, (1, D), dtype=jnp.float32)
    # Linear(1536, 512): uniform(-1/sqrt(fan_in), 1/sqrt(fan_in)), stored (in, out).
    bound = 1.0 / jnp.sqrt(jnp.float32(D))
    w = jax.random.uniform(kw, (D, DOUT), jnp.float32, -bound, bound)
    b = jax.random.uniform(kb, (1, DOUT), jnp.float32, -bound, bound)

    # One-time parameter preparation (affine fold + split + bf16 cast).
    wv, wt, bias_f = prepare_fusion_params(gamma, beta, w, b, DV)

    out = fusion_forward(visual, text, wv, wt, bias_f)
    out = jax.block_until_ready(out)

    ref = fusion_reference(visual, text, gamma, beta, w, b)
    assert out.shape == (B, DOUT)
    max_err = float(jnp.max(jnp.abs(out - ref)))
    # bf16 activations/weights vs the true f32 baseline: expect ~1e-2 max error.
    assert max_err < 5e-2, max_err

    print("KERNEL_OK")
</pallas_src>

<mosaic_0001>
module attributes {stable_mosaic.version = 11 : i64} {
  func.func @fusion_kernel(%arg0: i32, %arg1: memref<8x768xbf16, #tpu.memory_space<vmem>>, %arg2: memref<8x768xbf16, #tpu.memory_space<vmem>>, %arg3: memref<768x512xbf16, #tpu.memory_space<vmem>>, %arg4: memref<768x512xbf16, #tpu.memory_space<vmem>>, %arg5: memref<1x512xf32, #tpu.memory_space<vmem>>, %arg6: memref<8x512xf32, #tpu.memory_space<vmem>>) attributes {dimension_semantics = [#tpu.dimension_semantics<parallel>], iteration_bounds = array<i64: 1>, scalar_prefetch = 0 : i64, scratch_operands = 0 : i64, tpu.core_type = #tpu.core_type<tc>, window_params = [{transform_indices = @transform_0, window_bounds = array<i64: 8, 768>}, {transform_indices = @transform_1, window_bounds = array<i64: 8, 768>}, {pipeline_mode = #tpu.pipeline_mode<synchronous>, transform_indices = @transform_2, window_bounds = array<i64: 768, 512>}, {pipeline_mode = #tpu.pipeline_mode<synchronous>, transform_indices = @transform_3, window_bounds = array<i64: 768, 512>}, {pipeline_mode = #tpu.pipeline_mode<synchronous>, transform_indices = @transform_4, window_bounds = array<i64: 1, 512>}, {transform_indices = @transform_5, window_bounds = array<i64: 8, 512>}]} {
    %c0 = arith.constant 0 : index
    %c0_0 = arith.constant 0 : index
    %0 = vector.load %arg1[%c0, %c0_0] : memref<8x768xbf16, #tpu.memory_space<vmem>>, vector<8x768xbf16>
    %1 = arith.extf %0 : vector<8x768xbf16> to vector<8x768xf32>
    %c0_1 = arith.constant 0 : index
    %c0_2 = arith.constant 0 : index
    %2 = vector.load %arg2[%c0_1, %c0_2] : memref<8x768xbf16, #tpu.memory_space<vmem>>, vector<8x768xbf16>
    %3 = arith.extf %2 : vector<8x768xbf16> to vector<8x768xf32>
    %cst = arith.constant dense<0.000000e+00> : vector<8xf32>
    %4 = vector.multi_reduction <add>, %1, %cst [1] : vector<8x768xf32> to vector<8xf32>
    %5 = vector.shape_cast %4 : vector<8xf32> to vector<8x1xf32>
    %cst_3 = arith.constant dense<0.000000e+00> : vector<8xf32>
    %6 = vector.multi_reduction <add>, %3, %cst_3 [1] : vector<8x768xf32> to vector<8xf32>
    %7 = vector.shape_cast %6 : vector<8xf32> to vector<8x1xf32>
    %8 = arith.addf %5, %7 : vector<8x1xf32>
    %9 = arith.mulf %1, %1 : vector<8x768xf32>
    %cst_4 = arith.constant dense<0.000000e+00> : vector<8xf32>
    %10 = vector.multi_reduction <add>, %9, %cst_4 [1] : vector<8x768xf32> to vector<8xf32>
    %11 = vector.shape_cast %10 : vector<8xf32> to vector<8x1xf32>
    %12 = arith.mulf %3, %3 : vector<8x768xf32>
    %cst_5 = arith.constant dense<0.000000e+00> : vector<8xf32>
    %13 = vector.multi_reduction <add>, %12, %cst_5 [1] : vector<8x768xf32> to vector<8xf32>
    %14 = vector.shape_cast %13 : vector<8xf32> to vector<8x1xf32>
    %15 = arith.addf %11, %14 : vector<8x1xf32>
    %cst_6 = arith.constant 6.51041686E-4 : f32
    %16 = vector.broadcast %cst_6 : f32 to vector<8x1xf32>
    %17 = arith.mulf %8, %16 : vector<8x1xf32>
    %cst_7 = arith.constant 6.51041686E-4 : f32
    %18 = vector.broadcast %cst_7 : f32 to vector<8x1xf32>
    %19 = arith.mulf %15, %18 : vector<8x1xf32>
    %20 = arith.mulf %17, %17 : vector<8x1xf32>
    %21 = arith.subf %19, %20 : vector<8x1xf32>
    %cst_8 = arith.constant 9.99999974E-6 : f32
    %22 = vector.broadcast %cst_8 : f32 to vector<8x1xf32>
    %23 = arith.addf %21, %22 : vector<8x1xf32>
    %24 = math.rsqrt %23 : vector<8x1xf32>
    %25 = vector.broadcast %17 : vector<8x1xf32> to vector<8x768xf32>
    %26 = arith.subf %1, %25 : vector<8x768xf32>
    %27 = vector.broadcast %24 : vector<8x1xf32> to vector<8x768xf32>
    %28 = arith.mulf %26, %27 : vector<8x768xf32>
    %29 = arith.truncf %28 : vector<8x768xf32> to vector<8x768xbf16>
    %30 = vector.broadcast %17 : vector<8x1xf32> to vector<8x768xf32>
    %31 = arith.subf %3, %30 : vector<8x768xf32>
    %32 = vector.broadcast %24 : vector<8x1xf32> to vector<8x768xf32>
    %33 = arith.mulf %31, %32 : vector<8x768xf32>
    %34 = arith.truncf %33 : vector<8x768xf32> to vector<8x768xbf16>
    %c0_9 = arith.constant 0 : index
    %c0_10 = arith.constant 0 : index
    %35 = vector.load %arg3[%c0_9, %c0_10] : memref<768x512xbf16, #tpu.memory_space<vmem>>, vector<768x512xbf16>
    %cst_11 = arith.constant dense<0.000000e+00> : vector<8x512xf32>
    %36 = tpu.matmul %29, %35, %cst_11 {dimension_numbers = #tpu.dot_dimension_numbers<[1], [0], [0], [1], [0, 0, 1, 1], [], []>} : vector<8x768xbf16>, vector<768x512xbf16>, vector<8x512xf32> -> vector<8x512xf32>
    %c0_12 = arith.constant 0 : index
    %c0_13 = arith.constant 0 : index
    %37 = vector.load %arg4[%c0_12, %c0_13] : memref<768x512xbf16, #tpu.memory_space<vmem>>, vector<768x512xbf16>
    %cst_14 = arith.constant dense<0.000000e+00> : vector<8x512xf32>
    %38 = tpu.matmul %34, %37, %cst_14 {dimension_numbers = #tpu.dot_dimension_numbers<[1], [0], [0], [1], [0, 0, 1, 1], [], []>} : vector<8x768xbf16>, vector<768x512xbf16>, vector<8x512xf32> -> vector<8x512xf32>
    %39 = arith.addf %36, %38 : vector<8x512xf32>
    %c0_15 = arith.constant 0 : index
    %c0_16 = arith.constant 0 : index
    %40 = vector.load %arg5[%c0_15, %c0_16] : memref<1x512xf32, #tpu.memory_space<vmem>>, vector<1x512xf32>
    %41 = vector.broadcast %40 : vector<1x512xf32> to vector<8x512xf32>
    %42 = arith.addf %39, %41 : vector<8x512xf32>
    %cst_17 = arith.constant 0.000000e+00 : f32
    %43 = vector.broadcast %cst_17 : f32 to vector<8x512xf32>
    %44 = arith.maximumf %42, %43 : vector<8x512xf32>
    %c0_18 = arith.constant 0 : index
    %c0_19 = arith.constant 0 : index
    %45 = vector.load %arg6[%c0_18, %c0_19] : memref<8x512xf32, #tpu.memory_space<vmem>>, vector<8x512xf32>
    tpu.vector_store %arg6[%c0_18, %c0_19], %44 {strides = array<i32>} : memref<8x512xf32, #tpu.memory_space<vmem>>, vector<8x512xf32>,
    return
  }
  func.func @transform_0(%arg0: i32) -> (i32, i32) {
    %c0_i32 = arith.constant 0 : i32
    %c0_i32_0 = arith.constant 0 : i32
    return %arg0, %c0_i32 : i32, i32
  }
  func.func @transform_1(%arg0: i32) -> (i32, i32) {
    %c0_i32 = arith.constant 0 : i32
    %c0_i32_0 = arith.constant 0 : i32
    return %arg0, %c0_i32 : i32, i32
  }
  func.func @transform_2(%arg0: i32) -> (i32, i32) {
    %c0_i32 = arith.constant 0 : i32
    %c0_i32_0 = arith.constant 0 : i32
    %c0_i32_1 = arith.constant 0 : i32
    return %c0_i32, %c0_i32_0 : i32, i32
  }
  func.func @transform_3(%arg0: i32) -> (i32, i32) {
    %c0_i32 = arith.constant 0 : i32
    %c0_i32_0 = arith.constant 0 : i32
    %c0_i32_1 = arith.constant 0 : i32
    return %c0_i32, %c0_i32_0 : i32, i32
  }
  func.func @transform_4(%arg0: i32) -> (i32, i32) {
    %c0_i32 = arith.constant 0 : i32
    %c0_i32_0 = arith.constant 0 : i32
    %c0_i32_1 = arith.constant 0 : i32
    return %c0_i32, %c0_i32_0 : i32, i32
  }
  func.func @transform_5(%arg0: i32) -> (i32, i32) {
    %c0_i32 = arith.constant 0 : i32
    %c0_i32_0 = arith.constant 0 : i32
    return %arg0, %c0_i32 : i32, i32
  }
}

</mosaic_0001>

<bundles_post_ra>
// kernel: tpu_custom_call.1
= control target key start
LH: loop header
LB: loop body
LE: loop exit
PB: predicated region body
PF: predicated region fallthrough
CT: control target
= control target key end

     0   :  { %10 = vsyncpa [#allocation3], 0  ;;  %s4315_s0 = inlined_call_operand.hbm [shape: bf16[8,768], index: 0, kind: input, shape index: {}]   ;;  %s4316_s1 = inlined_call_operand.hbm [shape: bf16[8,768], index: 1, kind: input, shape index: {}]   ;;  %s4317_s2 = inlined_call_operand.hbm [shape: bf16[768,512], index: 2, kind: input, shape index: {}]   ;;  %s4318_s3 = inlined_call_operand.hbm [shape: bf16[768,512], index: 3, kind: input, shape index: {}]   ;;  %s4319_s4 = inlined_call_operand.vmem [shape: f32[1,512], index: 4, kind: input, shape index: {}]   ;;  %s4320_s5 = inlined_call_operand.hbm [shape: f32[8,512], index: 5, kind: output, shape index: {}]  }
   0x1   :  { %11 = vsyncpa [#allocation6], 0 }
   0x2   :  { %12 = vsyncpa [#allocation9], 0 }
   0x3   :  { %13 = vsyncpa [#allocation4], 0  ;;  %s4098_s18 = smov [#allocation5]   ;;  %s4099_s20 = smov [#allocation2]  }
   0x4   :  { %s30_s19 = sshll.u32 %s4098_s18, 4  ;;  %s20_s21 = sshll.u32 %s4099_s20, 4  ;;  %s31_s19 = int_to_ptr.vmem [resolvable:$true] %s30_s19  ;;  %s21_s21 = int_to_ptr.vmem [resolvable:$true] %s20_s21 }
   0x5   :  { %s3998_s22 = scalar_lea.vmem %s31_s19, 384  ;;  %p4003_p1 = scmp.lt.s32.totalorder %s31_s19, %s31_s19 }
   0x6   :  { %p3999_p0 = scmp.ne.s32.totalorder %s31_s19, %s3998_s22  ;;  %p4004_p2 = scmp.lt.s32.totalorder %s3998_s22, %s3998_s22 }
   0x8   :  { %p4005_p3 = por %p4004_p2, %p4003_p1 }
   0xa   :  { %p4006_p4 = pnand %p4005_p3, %p3999_p0 }
   0xc   :  { %4009 = shalt.err (!%p4006_p4)
}
   0xd   :  { %33 = dma.hbm_to_vmem [thread:$0]  %s4316_s1, 384, %s31_s19, [#allocation6]  }
   0xe   :  { %s4018_s25 = scalar_lea.vmem %s21_s21, 384  ;;  %p4023_p6 = scmp.lt.s32.totalorder %s21_s21, %s21_s21 }
   0xf   :  { %p4019_p5 = scmp.ne.s32.totalorder %s21_s21, %s4018_s25  ;;  %p4024_p7 = scmp.lt.s32.totalorder %s4018_s25, %s4018_s25 }
  0x11   :  { %p4025_p8 = por %p4024_p7, %p4023_p6 }
  0x13   :  { %p4026_p9 = pnand %p4025_p8, %p4019_p5 }
  0x15   :  { %4029 = shalt.err (!%p4026_p9)
}
  0x16   :  { %23 = dma.hbm_to_vmem [thread:$0]  %s4315_s0, 384, %s21_s21, [#allocation3]  }
  0x17   :  { %s4100_s28 = smov [#allocation7]  }
  0x18   :  { %s39_s29 = sshll.u32 %s4100_s28, 4  ;;  %s40_s29 = int_to_ptr.vmem [resolvable:$true] %s39_s29 }
  0x19   :  { %s4038_s30 = scalar_lea.vmem %s40_s29, 24576  ;;  %p4043_p11 = scmp.lt.s32.totalorder %s40_s29, %s40_s29 }
  0x1a   :  { %p4039_p10 = scmp.ne.s32.totalorder %s40_s29, %s4038_s30  ;;  %p4044_p12 = scmp.lt.s32.totalorder %s4038_s30, %s4038_s30 }
  0x1c   :  { %p4045_p13 = por %p4044_p12, %p4043_p11 }
  0x1e   :  { %p4046_p0 = pnand %p4045_p13, %p4039_p10 }
  0x20   :  { %4049 = shalt.err (!%p4046_p0)
}
  0x21   :  { %s4101_s1 = smov 256   ;;  %s4102_s6 = smov 16  }
  0x22   :  { %45 = dma.hbm_to_vmem [thread:$0]  %s4317_s2, 24576, %s40_s29, [#allocation6], %s4101_s1, %s4101_s1, %s4102_s6  }
  0x23   :  { %s4103_s9 = smov [#allocation8]  }
  0x24   :  { %s51_s10 = sshll.u32 %s4103_s9, 4  ;;  %s52_s10 = int_to_ptr.vmem [resolvable:$true] %s51_s10 }
  0x25   :  { %s4058_s0 = scalar_lea.vmem %s52_s10, 24576  ;;  %p4063_p2 = scmp.lt.s32.totalorder %s52_s10, %s52_s10 }
  0x26   :  { %p4059_p1 = scmp.ne.s32.totalorder %s52_s10, %s4058_s0  ;;  %p4064_p3 = scmp.lt.s32.totalorder %s4058_s0, %s4058_s0 }
  0x28   :  { %p4065_p4 = por %p4064_p3, %p4063_p2 }
  0x2a   :  { %p4066_p5 = pnand %p4065_p4, %p4059_p1 }
  0x2c   :  { %4069 = shalt.err (!%p4066_p5)
}
  0x2d   :  { %57 = dma.hbm_to_vmem [thread:$0]  %s4318_s3, 24576, %s52_s10, [#allocation9], %s4101_s1, %s4101_s1, %s4102_s6  }
  0x2e   :  { %4090 = dma.done.wait [#allocation3], 384  }
  0x2f   :  { %4091 = vsyncadd [#allocation3], 4294966912 }
  0x30   :  { %4092 = dma.done.wait [#allocation6], 24960  }
  0x31   :  { %4093 = vsyncadd [#allocation6], 4294942336 }
  0x32   :  { %4094 = dma.done.wait [#allocation9], 24576  }
  0x33   :  { %4095 = vsyncadd [#allocation9], 4294942720  ;;  %v72_v0 = vld [vmem:[#allocation2] sm:$0xff]  ;;  %v73_v1 = vld [vmem:[#allocation2 + $0x8] sm:$0xff] }
  0x34   :  { %v74_v2 = vld [vmem:[#allocation2 + $0x10] sm:$0xff]  ;;  %v4147_v3 = vunpack.c.l.bf16 %v72_v0  ;;  %v4149_v4 = vunpack.c.h.bf16 %v72_v0  ;;  %v4151_v5 = vunpack.c.l.bf16 %v73_v1  ;;  %v4153_v6 = vunpack.c.h.bf16 %v73_v1  ;;  %v81_v7 = vld [vmem:[#allocation5] sm:$0xff]  ;;  %v82_v8 = vld [vmem:[#allocation5 + $0x8] sm:$0xff] }
  0x35   :  { %v83_v9 = vld [vmem:[#allocation5 + $0x10] sm:$0xff]  ;;  %v4155_v10 = vunpack.c.l.bf16 %v74_v2  ;;  %v4157_v11 = vunpack.c.l.bf16 %v81_v7  ;;  %v4159_v12 = vunpack.c.h.bf16 %v81_v7  ;;  %v3412_v13 = vld [vmem:[#allocation8 + $0xe4] ss:$16 sps:$4 sm:$0xff]   ;;  %v4169_v19 = vunpack.c.h.bf16 %v74_v2  ;;  %v3416_v21 = vld [vmem:[#allocation8 + $0xe0] ss:$16 sps:$4 sm:$0xff]  }
  0x36   :  { %v90_v14 = vadd.f32 %v4149_v4, %v4147_v3  ;;  %v105_v15 = vmul.f32 %v4147_v3, %v4147_v3  ;;  %v106_v16 = vmul.f32 %v4149_v4, %v4149_v4  ;;  %v107_v17 = vmul.f32 %v4151_v5, %v4151_v5  ;;  %v3414_v18 = vld [vmem:[#allocation8 + $0x2e4] ss:$16 sps:$4 sm:$0xff]   ;;  %1518 = vmatprep.subr.bf16.mxu0 %v3412_v13  ;;  %v3417_v22 = vld [vmem:[#allocation8 + $0x2e0] ss:$16 sps:$4 sm:$0xff]  }
  0x37   :  { %v4171_v20 = vunpack.c.l.bf16 %v82_v8  ;;  %v108_v24 = vmul.f32 %v4153_v6, %v4153_v6  ;;  %v4176_v26 = vunpack.c.h.bf16 %v82_v8  ;;  %1559 = vmatprep.subr.bf16.mxu1 %v3414_v18  ;;  %v3418_v27 = vld [vmem:[#allocation8 + $0xc4] ss:$16 sps:$4 sm:$0xff]   ;;  %v4178_v28 = vunpack.c.l.bf16 %v83_v9  ;;  %1519 = vmatpush1.bf16.msra.mxu0 %v3416_v21  ;;  %v3422_v33 = vld [vmem:[#allocation8 + $0xc0] ss:$16 sps:$4 sm:$0xff]  }
  0x38   :  { %v91_v23 = vadd.f32 %v90_v14, %v4151_v5  ;;  %v111_v25 = vadd.f32 %v106_v16, %v105_v15  ;;  %v97_v29 = vadd.f32 %v4159_v12, %v4157_v11  ;;  %v118_v30 = vmul.f32 %v4157_v11, %v4157_v11  ;;  %1560 = vmatpush1.bf16.msra.mxu1 %v3417_v22  ;;  %v3420_v32 = vld [vmem:[#allocation8 + $0x2c4] ss:$16 sps:$4 sm:$0xff]   ;;  %v3423_v38 = vld [vmem:[#allocation8 + $0x2c0] ss:$16 sps:$4 sm:$0xff]  }
  0x39   :  { %v119_v31 = vmul.f32 %v4159_v12, %v4159_v12  ;;  %v109_v35 = vmul.f32 %v4155_v10, %v4155_v10  ;;  %v120_v37 = vmul.f32 %v4171_v20, %v4171_v20  ;;  %1520 = vmatprep.subr.bf16.mxu0 %v3418_v27  ;;  %v4191_v39 = vunpack.c.h.bf16 %v83_v9  ;;  %1561 = vmatprep.subr.bf16.mxu1 %v3420_v32  ;;  %v3424_v43 = vld [vmem:[#allocation8 + $0xa4] ss:$16 sps:$4 sm:$0xff]   ;;  %v3428_v48 = vld [vmem:[#allocation8 + $0xa0] ss:$16 sps:$4 sm:$0xff]  }
  0x3a   :  { %v92_v34 = vadd.f32 %v91_v23, %v4153_v6  ;;  %v112_v36 = vadd.f32 %v111_v25, %v107_v17  ;;  %v98_v40 = vadd.f32 %v97_v29, %v4171_v20  ;;  %v121_v41 = vmul.f32 %v4176_v26, %v4176_v26  ;;  %v3426_v47 = vld [vmem:[#allocation8 + $0x2a4] ss:$16 sps:$4 sm:$0xff]   ;;  %v3429_v52 = vld [vmem:[#allocation8 + $0x2a0] ss:$16 sps:$4 sm:$0xff]  }
  0x3b   :  { %v124_v42 = vadd.f32 %v119_v31, %v118_v30  ;;  %v110_v45 = vmul.f32 %v4169_v19, %v4169_v19  ;;  %v122_v50 = vmul.f32 %v4178_v28, %v4178_v28  ;;  %1521 = vmatpush1.bf16.msra.mxu0 %v3422_v33  ;;  %v3430_v55 = vld [vmem:[#allocation8 + $0x84] ss:$16 sps:$4 sm:$0xff]   ;;  %v123_v57 = vmul.f32 %v4191_v39, %v4191_v39  ;;  %v3434_v63 = vld [vmem:[#allocation8 + $0x80] ss:$16 sps:$4 sm:$0xff]  }
  0x3c   :  { %v93_v44 = vadd.f32 %v92_v34, %v4155_v10  ;;  %v113_v46 = vadd.f32 %v112_v36, %v108_v24  ;;  %v99_v49 = vadd.f32 %v98_v40, %v4176_v26  ;;  %1562 = vmatpush1.bf16.msra.mxu1 %v3423_v38  ;;  %1522 = vmatprep.subr.bf16.mxu0 %v3424_v43  ;;  %v3432_v59 = vld [vmem:[#allocation8 + $0x284] ss:$16 sps:$4 sm:$0xff]   ;;  %v3435_v0 = vld [vmem:[#allocation8 + $0x280] ss:$16 sps:$4 sm:$0xff]  }
  0x3d   :  { %v125_v51 = vadd.f32 %v124_v42, %v120_v37  ;;  %1563 = vmatprep.subr.bf16.mxu1 %v3426_v47  ;;  %v3436_v1 = vld [vmem:[#allocation8 + $0x64] ss:$16 sps:$4 sm:$0xff]   ;;  %v3440_v8 = vld [vmem:[#allocation8 + $0x60] ss:$16 sps:$4 sm:$0xff]  }
  0x3e   :  { %v94_v53 = vadd.f32 %v93_v44, %v4169_v19  ;;  %v114_v54 = vadd.f32 %v113_v46, %v109_v35  ;;  %v100_v56 = vadd.f32 %v99_v49, %v4178_v28  ;;  %v3438_v7 = vld [vmem:[#allocation8 + $0x264] ss:$16 sps:$4 sm:$0xff]   ;;  %v3441_v9 = vld [vmem:[#allocation8 + $0x260] ss:$16 sps:$4 sm:$0xff]  }
  0x3f   :  { %v126_v58 = vadd.f32 %v125_v51, %v121_v41  ;;  %1523 = vmatpush1.bf16.msra.mxu0 %v3428_v48  ;;  %v3442_v13 = vld [vmem:[#allocation8 + $0x44] ss:$16 sps:$4 sm:$0xff]   ;;  %v3446_v15 = vld [vmem:[#allocation8 + $0x40] ss:$16 sps:$4 sm:$0xff]  }
  0x40   :  { %95 = vadd.xlane.f32.xlu0 %v94_v53  ;;  %v115_v60 = vadd.f32 %v114_v54, %v110_v45  ;;  %v101_v61 = vadd.f32 %v100_v56, %v4191_v39  ;;  %1564 = vmatpush1.bf16.msra.mxu1 %v3429_v52  ;;  %v3444_v14 = vld [vmem:[#allocation8 + $0x244] ss:$16 sps:$4 sm:$0xff]   ;;  %v3447_v16 = vld [vmem:[#allocation8 + $0x240] ss:$16 sps:$4 sm:$0xff]  }
  0x41   :  { %v127_v62 = vadd.f32 %v126_v58, %v122_v50  ;;  %1524 = vmatprep.subr.bf16.mxu0 %v3430_v55  ;;  %1565 = vmatprep.subr.bf16.mxu1 %v3432_v59  ;;  %v3448_v17 = vld [vmem:[#allocation8 + $0x24] ss:$16 sps:$4 sm:$0xff]   ;;  %v3452_v21 = vld [vmem:[#allocation8 + $0x20] ss:$16 sps:$4 sm:$0xff]  }
  0x42   :  { %116 = vadd.xlane.f32.xlu1 %v115_v60  ;;  %v3450_v18 = vld [vmem:[#allocation8 + $0x224] ss:$16 sps:$4 sm:$0xff]   ;;  %v3453_v22 = vld [vmem:[#allocation8 + $0x220] ss:$16 sps:$4 sm:$0xff]  }
  0x43   :  { %v128_v2 = vadd.f32 %v127_v62, %v123_v57  ;;  %1525 = vmatpush1.bf16.msra.mxu0 %v3434_v63  ;;  %v3454_v23 = vld [vmem:[#allocation8 + $0x4] ss:$16 sps:$4 sm:$0xff]   ;;  %v3458_v25 = vld [vmem:[#allocation8] ss:$16 sps:$4 sm:$0xff]   ;;  %v3513_v63 = vld [vmem:[#allocation8 + $0xec] ss:$16 sps:$4 sm:$0xff]  }
  0x44   :  { %102 = vadd.xlane.f32.xlu0 %v101_v61  ;;  %1566 = vmatpush1.bf16.msra.mxu1 %v3435_v0  ;;  %v3456_v24 = vld [vmem:[#allocation8 + $0x204] ss:$16 sps:$4 sm:$0xff]   ;;  %v3459_v27 = vld [vmem:[#allocation8 + $0x200] ss:$16 sps:$4 sm:$0xff]  }
  0x45   :  { %1526 = vmatprep.subr.bf16.mxu0 %v3436_v1  ;;  %1567 = vmatprep.subr.bf16.mxu1 %v3438_v7  ;;  %v3460_v29 = vld [vmem:[#allocation8 + $0x1e4] ss:$16 sps:$4 sm:$0xff]   ;;  %v3464_v31 = vld [vmem:[#allocation8 + $0x1e0] ss:$16 sps:$4 sm:$0xff]  }
  0x46   :  { %129 = vadd.xlane.f32.xlu1 %v128_v2  ;;  %v3462_v30 = vld [vmem:[#allocation8 + $0x3e4] ss:$16 sps:$4 sm:$0xff]   ;;  %v3465_v32 = vld [vmem:[#allocation8 + $0x3e0] ss:$16 sps:$4 sm:$0xff]  }
  0x47   :  { %1527 = vmatpush1.bf16.msra.mxu0 %v3440_v8  ;;  %v3466_v33 = vld [vmem:[#allocation8 + $0x1c4] ss:$16 sps:$4 sm:$0xff]   ;;  %v3470_v35 = vld [vmem:[#allocation8 + $0x1c0] ss:$16 sps:$4 sm:$0xff]  }
  0x48   :  { %1568 = vmatpush1.bf16.msra.mxu1 %v3441_v9  ;;  %1528 = vmatprep.subr.bf16.mxu0 %v3442_v13  ;;  %v3468_v34 = vld [vmem:[#allocation8 + $0x3c4] ss:$16 sps:$4 sm:$0xff]   ;;  %v3471_v36 = vld [vmem:[#allocation8 + $0x3c0] ss:$16 sps:$4 sm:$0xff]  }
  0x49   :  { %1569 = vmatprep.subr.bf16.mxu1 %v3444_v14  ;;  %v3472_v37 = vld [vmem:[#allocation8 + $0x1a4] ss:$16 sps:$4 sm:$0xff]   ;;  %v3476_v40 = vld [vmem:[#allocation8 + $0x1a0] ss:$16 sps:$4 sm:$0xff]  }
  0x4a   :  { %v3474_v38 = vld [vmem:[#allocation8 + $0x3a4] ss:$16 sps:$4 sm:$0xff]   ;;  %v3477_v41 = vld [vmem:[#allocation8 + $0x3a0] ss:$16 sps:$4 sm:$0xff]  }
  0x4b   :  { %1529 = vmatpush1.bf16.msra.mxu0 %v3446_v15  ;;  %v3478_v42 = vld [vmem:[#allocation8 + $0x184] ss:$16 sps:$4 sm:$0xff]   ;;  %v3482_v44 = vld [vmem:[#allocation8 + $0x180] ss:$16 sps:$4 sm:$0xff]  }
  0x4c   :  { %1570 = vmatpush1.bf16.msra.mxu1 %v3447_v16  ;;  %1530 = vmatprep.subr.bf16.mxu0 %v3448_v17  ;;  %v3480_v43 = vld [vmem:[#allocation8 + $0x384] ss:$16 sps:$4 sm:$0xff]   ;;  %v3483_v45 = vld [vmem:[#allocation8 + $0x380] ss:$16 sps:$4 sm:$0xff]  }
  0x4d   :  { %1571 = vmatprep.subr.bf16.mxu1 %v3450_v18  ;;  %v3484_v46 = vld [vmem:[#allocation8 + $0x164] ss:$16 sps:$4 sm:$0xff]   ;;  %v3488_v48 = vld [vmem:[#allocation8 + $0x160] ss:$16 sps:$4 sm:$0xff]  }
  0x4e   :  { %v3486_v47 = vld [vmem:[#allocation8 + $0x364] ss:$16 sps:$4 sm:$0xff]   ;;  %v3489_v49 = vld [vmem:[#allocation8 + $0x360] ss:$16 sps:$4 sm:$0xff]  }
  0x4f   :  { %1531 = vmatpush1.bf16.msra.mxu0 %v3452_v21  ;;  %v3490_v50 = vld [vmem:[#allocation8 + $0x144] ss:$16 sps:$4 sm:$0xff]   ;;  %v3494_v52 = vld [vmem:[#allocation8 + $0x140] ss:$16 sps:$4 sm:$0xff]  }
  0x50   :  { %1572 = vmatpush1.bf16.msra.mxu1 %v3453_v22  ;;  %1532 = vmatprep.subr.bf16.mxu0 %v3454_v23  ;;  %v3492_v51 = vld [vmem:[#allocation8 + $0x344] ss:$16 sps:$4 sm:$0xff]   ;;  %v3495_v53 = vld [vmem:[#allocation8 + $0x340] ss:$16 sps:$4 sm:$0xff]  }
  0x51   :  { %1573 = vmatprep.subr.bf16.mxu1 %v3456_v24  ;;  %v3496_v54 = vld [vmem:[#allocation8 + $0x124] ss:$16 sps:$4 sm:$0xff]   ;;  %v3500_v56 = vld [vmem:[#allocation8 + $0x120] ss:$16 sps:$4 sm:$0xff]  }
  0x52   :  { %v3498_v55 = vld [vmem:[#allocation8 + $0x324] ss:$16 sps:$4 sm:$0xff]   ;;  %v3501_v57 = vld [vmem:[#allocation8 + $0x320] ss:$16 sps:$4 sm:$0xff]  }
  0x53   :  { %1533 = vmatpush1.bf16.msra.mxu0 %v3458_v25  ;;  %v3502_v58 = vld [vmem:[#allocation8 + $0x104] ss:$16 sps:$4 sm:$0xff]   ;;  %v3506_v60 = vld [vmem:[#allocation8 + $0x100] ss:$16 sps:$4 sm:$0xff]  }
  0x54   :  { %1574 = vmatpush1.bf16.msra.mxu1 %v3459_v27  ;;  %1534 = vmatprep.subr.bf16.mxu0 %v3460_v29  ;;  %v3504_v59 = vld [vmem:[#allocation8 + $0x304] ss:$16 sps:$4 sm:$0xff]   ;;  %v3507_v61 = vld [vmem:[#allocation8 + $0x300] ss:$16 sps:$4 sm:$0xff]  }
  0x55   :  { %1575 = vmatprep.subr.bf16.mxu1 %v3462_v30  ;;  %v3510_v62 = vld [vmem:[#allocation8 + $0x4e4] ss:$16 sps:$4 sm:$0xff]  }
  0x57   :  { %1535 = vmatpush2.bf16.msra.mxu0 %v3464_v31 }
  0x58   :  { %1576 = vmatpush2.bf16.msra.mxu1 %v3465_v32  ;;  %1536 = vmatprep.subr.bf16.mxu0 %v3466_v33 }
  0x59   :  { %1577 = vmatprep.subr.bf16.mxu1 %v3468_v34  ;;  %v3511_v34 = vld [vmem:[#allocation8 + $0xe8] ss:$16 sps:$4 sm:$0xff]  }
  0x5b   :  { %1537 = vmatpush2.bf16.msra.mxu0 %v3470_v35 }
  0x5c   :  { %1578 = vmatpush2.bf16.msra.mxu1 %v3471_v36  ;;  %1538 = vmatprep.subr.bf16.mxu0 %v3472_v37 }
  0x5d   :  { %1579 = vmatprep.subr.bf16.mxu1 %v3474_v38 }
  0x5f   :  { %1539 = vmatpush2.bf16.msra.mxu0 %v3476_v40  ;;  %v3514_v40 = vld [vmem:[#allocation8 + $0x4c0] ss:$16 sps:$4 sm:$0xff]  }
  0x60   :  { %1580 = vmatpush2.bf16.msra.mxu1 %v3477_v41  ;;  %1540 = vmatprep.subr.bf16.mxu0 %v3478_v42  ;;  %v3517_v41 = vld [vmem:[#allocation8 + $0xc8] ss:$16 sps:$4 sm:$0xff]   ;;  %v3519_v42 = vld [vmem:[#allocation8 + $0xcc] ss:$16 sps:$4 sm:$0xff]  }
  0x61   :  { %1581 = vmatprep.subr.bf16.mxu1 %v3480_v43 }
  0x63   :  { %1541 = vmatpush2.bf16.msra.mxu0 %v3482_v44 }
  0x64   :  { %1582 = vmatpush2.bf16.msra.mxu1 %v3483_v45  ;;  %1542 = vmatprep.subr.bf16.mxu0 %v3484_v46 }
  0x65   :  { %1583 = vmatprep.subr.bf16.mxu1 %v3486_v47  ;;  %v3522_v47 = vld [vmem:[#allocation8 + $0x4a4] ss:$16 sps:$4 sm:$0xff]  }
  0x67   :  { %1543 = vmatpush2.bf16.msra.mxu0 %v3488_v48 }
  0x68   :  { %1584 = vmatpush2.bf16.msra.mxu1 %v3489_v49  ;;  %1544 = vmatprep.subr.bf16.mxu0 %v3490_v50  ;;  %v3520_v49 = vld [vmem:[#allocation8 + $0x4a0] ss:$16 sps:$4 sm:$0xff]   ;;  %v3523_v50 = vld [vmem:[#allocation8 + $0xa8] ss:$16 sps:$4 sm:$0xff]  }
  0x69   :  { %1585 = vmatprep.subr.bf16.mxu1 %v3492_v51  ;;  %v3528_v51 = vld [vmem:[#allocation8 + $0x484] ss:$16 sps:$4 sm:$0xff]  }
  0x6b   :  { %1545 = vmatpush2.bf16.msra.mxu0 %v3494_v52  ;;  %v3531_v52 = vld [vmem:[#allocation8 + $0x8c] ss:$16 sps:$4 sm:$0xff]  }
  0x6c   :  { %1586 = vmatpush2.bf16.msra.mxu1 %v3495_v53  ;;  %1546 = vmatprep.subr.bf16.mxu0 %v3496_v54  ;;  %v3526_v53 = vld [vmem:[#allocation8 + $0x480] ss:$16 sps:$4 sm:$0xff]   ;;  %v3529_v54 = vld [vmem:[#allocation8 + $0x88] ss:$16 sps:$4 sm:$0xff]  }
  0x6d   :  { %1587 = vmatprep.subr.bf16.mxu1 %v3498_v55  ;;  %v3534_v55 = vld [vmem:[#allocation8 + $0x464] ss:$16 sps:$4 sm:$0xff]  }
  0x6f   :  { %1547 = vmatpush2.bf16.msra.mxu0 %v3500_v56  ;;  %v3537_v56 = vld [vmem:[#allocation8 + $0x6c] ss:$16 sps:$4 sm:$0xff]  }
  0x70   :  { %1588 = vmatpush2.bf16.msra.mxu1 %v3501_v57  ;;  %1548 = vmatprep.subr.bf16.mxu0 %v3502_v58  ;;  %v3532_v57 = vld [vmem:[#allocation8 + $0x460] ss:$16 sps:$4 sm:$0xff]   ;;  %v3535_v58 = vld [vmem:[#allocation8 + $0x68] ss:$16 sps:$4 sm:$0xff]  }
  0x71   :  { %1589 = vmatprep.subr.bf16.mxu1 %v3504_v59  ;;  %v3540_v59 = vld [vmem:[#allocation8 + $0x444] ss:$16 sps:$4 sm:$0xff]  }
  0x73   :  { %1549 = vmatpush2.bf16.msra.mxu0 %v3506_v60  ;;  %v3543_v60 = vld [vmem:[#allocation8 + $0x4c] ss:$16 sps:$4 sm:$0xff]  }
  0x74   :  { %1590 = vmatpush2.bf16.msra.mxu1 %v3507_v61  ;;  %1600 = vmatprep.subr.bf16.mxu0 %v3510_v62  ;;  %v3538_v61 = vld [vmem:[#allocation8 + $0x440] ss:$16 sps:$4 sm:$0xff]   ;;  %v3541_v62 = vld [vmem:[#allocation8 + $0x48] ss:$16 sps:$4 sm:$0xff]  }
  0x75   :  { %1641 = vmatprep.subr.bf16.mxu1 %v3513_v63  ;;  %v3546_v63 = vld [vmem:[#allocation8 + $0x424] ss:$16 sps:$4 sm:$0xff]  }
  0xc9   :  { %v96_v0 = vpop.xlane.xlu0 %95 }
  0xcb   :  { %v117_v1 = vpop.xlane.xlu1 %116 }
  0xcd   :  { %v103_v2 = vpop.xlane.xlu0 %102 }
  0xce   :  { %v104_v7 = vadd.f32 %v103_v2, %v96_v0  ;;  %v3549_v0 = vld [vmem:[#allocation8 + $0x2c] ss:$16 sps:$4 sm:$0xff]   ;;  %v3547_v2 = vld [vmem:[#allocation8 + $0x28] ss:$16 sps:$4 sm:$0xff]  }
  0xcf   :  { %v130_v8 = vpop.xlane.xlu1 %129 }
  0xd0   :  { %v132_v9 = vmul.f32 0.0006510417, %v104_v7  ;;  %v131_v13 = vadd.f32 %v130_v8, %v117_v1  ;;  %v3544_v1 = vld [vmem:[#allocation8 + $0x420] ss:$16 sps:$4 sm:$0xff]   ;;  %v3552_v7 = vld [vmem:[#allocation8 + $0x404] ss:$16 sps:$4 sm:$0xff]  }
  0xd1   :  { %v3555_v8 = vld [vmem:[#allocation8 + $0xc] ss:$16 sps:$4 sm:$0xff]  }
  0xd2   :  { %v133_v14 = vmul.f32 0.0006510417, %v131_v13  ;;  %v134_v15 = vmul.f32 %v132_v9, %v132_v9  ;;  %v157_v18 = vsub.f32 %v4159_v12, %v132_v9  ;;  %v159_v21 = vsub.f32 %v4176_v26, %v132_v9  ;;  %v3553_v13 = vld [vmem:[#allocation8 + $0x8] ss:$16 sps:$4 sm:$0xff]  }
  0xd3   :  { %v156_v22 = vsub.f32 %v4157_v11, %v132_v9  ;;  %v158_v23 = vsub.f32 %v4171_v20, %v132_v9  ;;  %v161_v24 = vsub.f32 %v4191_v39, %v132_v9  ;;  %v160_v25 = vsub.f32 %v4178_v28, %v132_v9  ;;  %v3508_v11 = vld [vmem:[#allocation8 + $0x4e0] ss:$16 sps:$4 sm:$0xff]  }
  0xd4   :  { %v135_v16 = vsub.f32 %v133_v14, %v134_v15  ;;  %v139_v27 = vsub.f32 %v4149_v4, %v132_v9  ;;  %v141_v30 = vsub.f32 %v4153_v6, %v132_v9  ;;  %v138_v31 = vsub.f32 %v4147_v3, %v132_v9  ;;  %v3558_v14 = vld [vmem:[#allocation8 + $0x5e4] ss:$16 sps:$4 sm:$0xff]   ;;  %v3561_v15 = vld [vmem:[#allocation8 + $0x1ec] ss:$16 sps:$4 sm:$0xff]  }
  0xd5   :  { %v140_v32 = vsub.f32 %v4151_v5, %v132_v9  ;;  %v143_v12 = vsub.f32 %v4169_v19, %v132_v9  ;;  %v3516_v19 = vld [vmem:[#allocation8 + $0x4c4] ss:$16 sps:$4 sm:$0xff]   ;;  %v142_v38 = vsub.f32 %v4155_v10, %v132_v9  ;;  %v3525_v10 = vld [vmem:[#allocation8 + $0xac] ss:$16 sps:$4 sm:$0xff]   ;;  %v3550_v9 = vld [vmem:[#allocation8 + $0x400] ss:$16 sps:$4 sm:$0xff]  }
  0xd6   :  { %v136_v17 = vadd.f32 1e-05, %v135_v16  ;;  %v3556_v16 = vld [vmem:[#allocation8 + $0x5e0] ss:$16 sps:$4 sm:$0xff]  }
  0xd8   :  { %3988 = vrsqrt.f32 %v136_v17  ;;  %v3559_v17 = vld [vmem:[#allocation8 + $0x1e8] ss:$16 sps:$4 sm:$0xff]  }
  0xe5   :  { %v3989_v29 = vpop.eup %3988 }
  0xe6   :  { %v163_v26 = vmul.f32 %v3989_v29, %v157_v18  ;;  %v165_v33 = vmul.f32 %v3989_v29, %v159_v21  ;;  %v162_v20 = vmul.f32 %v3989_v29, %v156_v22  ;;  %v164_v35 = vmul.f32 %v3989_v29, %v158_v23  ;;  %v3564_v18 = vld [vmem:[#allocation8 + $0x5c4] ss:$16 sps:$4 sm:$0xff]   ;;  %v3567_v21 = vld [vmem:[#allocation8 + $0x1cc] ss:$16 sps:$4 sm:$0xff]   ;;  %v3562_v22 = vld [vmem:[#allocation8 + $0x5c0] ss:$16 sps:$4 sm:$0xff]  }
  0xe7   :  { %v167_v39 = vmul.f32 %v3989_v29, %v161_v24  ;;  %v4218_v36 = vmul.f32 %v3989_v29, %v160_v25  ;;  %v4220_v28 = vmul.f32 %v3989_v29, %v139_v27  ;;  %v4222_v4 = vmul.f32 %v3989_v29, %v141_v30  ;;  %v3565_v23 = vld [vmem:[#allocation8 + $0x1c8] ss:$16 sps:$4 sm:$0xff]   ;;  %v3570_v24 = vld [vmem:[#allocation8 + $0x5a4] ss:$16 sps:$4 sm:$0xff]   ;;  %v3573_v25 = vld [vmem:[#allocation8 + $0x1ac] ss:$16 sps:$4 sm:$0xff]  }
  0xe8   :  { %v169_v6 = vpack.c.bf16 %v163_v26, %v163_v26  ;;  %v4224_v37 = vpack.c.bf16 %v165_v33, %v165_v33  ;;  %v4226_v3 = vpack.c.bf16 %v162_v20, %v162_v20  ;;  %v4228_v5 = vpack.c.bf16 %v164_v35, %v164_v35  ;;  %v3568_v27 = vld [vmem:[#allocation8 + $0x5a0] ss:$16 sps:$4 sm:$0xff]   ;;  %v3576_v30 = vld [vmem:[#allocation8 + $0x584] ss:$16 sps:$4 sm:$0xff]   ;;  %v3585_v33 = vld [vmem:[#allocation8 + $0x16c] ss:$16 sps:$4 sm:$0xff]  }
  0xe9   :  { %v4232_v43 = vmul.f32 %v3989_v29, %v138_v31  ;;  %v4234_v44 = vmul.f32 %v3989_v29, %v140_v32  ;;  %v4236_v45 = vmul.f32 %v3989_v29, %v143_v12  ;;  %v4240_v46 = vpack.c.bf16 %v167_v39, %v167_v39  ;;  %v3579_v31 = vld [vmem:[#allocation8 + $0x18c] ss:$16 sps:$4 sm:$0xff]   ;;  %v3574_v32 = vld [vmem:[#allocation8 + $0x580] ss:$16 sps:$4 sm:$0xff]   ;;  %v3577_v12 = vld [vmem:[#allocation8 + $0x188] ss:$16 sps:$4 sm:$0xff]  }
  0xea   :  { %1550 = vmatprep.mubr.bf16.mxu0 %v169_v6  ;;  %1591 = vmatprep.mubr.bf16.mxu1 %v4224_v37  ;;  %v4242_v48 = vmul.f32 %v3989_v29, %v142_v38  ;;  %v3571_v29 = vld [vmem:[#allocation8 + $0x1a8] ss:$16 sps:$4 sm:$0xff]   ;;  %v3582_v26 = vld [vmem:[#allocation8 + $0x564] ss:$16 sps:$4 sm:$0xff]   ;;  %v3591_v35 = vld [vmem:[#allocation8 + $0x14c] ss:$16 sps:$4 sm:$0xff]  }
  0xeb   :  { %1551 = vmatmul.mubr.bf16.vlgmr.msra.gmra.mxu0 %v4226_v3  ;;  %1592 = vmatmul.mubr.bf16.vlgmr.msra.gmra.mxu1 %v4228_v5  ;;  %v3588_v20 = vld [vmem:[#allocation8 + $0x544] ss:$16 sps:$4 sm:$0xff]   ;;  %v3586_v39 = vld [vmem:[#allocation8 + $0x540] ss:$16 sps:$4 sm:$0xff]   ;;  %v3597_v38 = vld [vmem:[#allocation8 + $0x12c] ss:$16 sps:$4 sm:$0xff]  }
  0xec   :  { %1601 = vmatpush1.bf16.msra.mxu0 %v3508_v11  ;;  %1642 = vmatpush1.bf16.msra.mxu1 %v3511_v34  ;;  %v3580_v11 = vld [vmem:[#allocation8 + $0x560] ss:$16 sps:$4 sm:$0xff]   ;;  %v3583_v34 = vld [vmem:[#allocation8 + $0x168] ss:$16 sps:$4 sm:$0xff]  }
  0xed   :  { %1632 = vmatprep.mubr.bf16.mxu0 %v4240_v46  ;;  %1673 = vmatprep.mubr.bf16.mxu1 %v169_v6  ;;  %v3589_v6 = vld [vmem:[#allocation8 + $0x148] ss:$16 sps:$4 sm:$0xff]  }
  0xee   :  { %1602 = vmatprep.subr.bf16.mxu0 %v3516_v19  ;;  %1643 = vmatprep.subr.bf16.mxu1 %v3519_v42  ;;  %v3594_v19 = vld [vmem:[#allocation8 + $0x524] ss:$16 sps:$4 sm:$0xff]  }
  0xef   :  { %v3600_v42 = vld [vmem:[#allocation8 + $0x504] ss:$16 sps:$4 sm:$0xff]  }
  0xf0   :  { %1603 = vmatpush1.bf16.msra.mxu0 %v3514_v40  ;;  %1644 = vmatpush1.bf16.msra.mxu1 %v3517_v41  ;;  %v3592_v40 = vld [vmem:[#allocation8 + $0x520] ss:$16 sps:$4 sm:$0xff]   ;;  %v3595_v41 = vld [vmem:[#allocation8 + $0x128] ss:$16 sps:$4 sm:$0xff]  }
  0xf1   :  { %1604 = vmatprep.subr.bf16.mxu0 %v3522_v47  ;;  %1645 = vmatprep.subr.bf16.mxu1 %v3525_v10  ;;  %v3603_v47 = vld [vmem:[#allocation8 + $0x10c] ss:$16 sps:$4 sm:$0xff]   ;;  %v3598_v10 = vld [vmem:[#allocation8 + $0x500] ss:$16 sps:$4 sm:$0xff]  }
  0xf4   :  { %1605 = vmatpush1.bf16.msra.mxu0 %v3520_v49  ;;  %1646 = vmatpush1.bf16.msra.mxu1 %v3523_v50  ;;  %v3601_v49 = vld [vmem:[#allocation8 + $0x108] ss:$16 sps:$4 sm:$0xff]   ;;  %v3606_v50 = vld [vmem:[#allocation8 + $0x2ec] ss:$16 sps:$4 sm:$0xff]  }
  0xf5   :  { %1606 = vmatprep.subr.bf16.mxu0 %v3528_v51  ;;  %1647 = vmatprep.subr.bf16.mxu1 %v3531_v52  ;;  %v3609_v51 = vld [vmem:[#allocation8 + $0x4ec] ss:$16 sps:$4 sm:$0xff]   ;;  %v3604_v52 = vld [vmem:[#allocation8 + $0x2e8] ss:$16 sps:$4 sm:$0xff]  }
  0xf8   :  { %1607 = vmatpush1.bf16.msra.mxu0 %v3526_v53  ;;  %1648 = vmatpush1.bf16.msra.mxu1 %v3529_v54  ;;  %v4247_v53 = vpack.c.bf16 %v4218_v36, %v4218_v36  ;;  %v3607_v54 = vld [vmem:[#allocation8 + $0x4e8] ss:$16 sps:$4 sm:$0xff]   ;;  %v3621_v36 = vld [vmem:[#allocation8 + $0x4ac] ss:$16 sps:$4 sm:$0xff]  }
  0xf9   :  { %1608 = vmatprep.subr.bf16.mxu0 %v3534_v55  ;;  %1649 = vmatprep.subr.bf16.mxu1 %v3537_v56  ;;  %v3612_v55 = vld [vmem:[#allocation8 + $0x2cc] ss:$16 sps:$4 sm:$0xff]  }
  0xfa   :  { %v3615_v56 = vld [vmem:[#allocation8 + $0x4cc] ss:$16 sps:$4 sm:$0xff]  }
  0xfc   :  { %1609 = vmatpush1.bf16.msra.mxu0 %v3532_v57  ;;  %1650 = vmatpush1.bf16.msra.mxu1 %v3535_v58  ;;  %v3610_v57 = vld [vmem:[#allocation8 + $0x2c8] ss:$16 sps:$4 sm:$0xff]  }
  0xfd   :  { %1610 = vmatprep.subr.bf16.mxu0 %v3540_v59  ;;  %1651 = vmatprep.subr.bf16.mxu1 %v3543_v60  ;;  %v3613_v58 = vld [vmem:[#allocation8 + $0x4c8] ss:$16 sps:$4 sm:$0xff]   ;;  %v3618_v59 = vld [vmem:[#allocation8 + $0x2ac] ss:$16 sps:$4 sm:$0xff]  }
  0xfe   :  { %v3616_v60 = vld [vmem:[#allocation8 + $0x2a8] ss:$16 sps:$4 sm:$0xff]  }
 0x100   :  { %1611 = vmatpush1.bf16.msra.mxu0 %v3538_v61  ;;  %1652 = vmatpush1.bf16.msra.mxu1 %v3541_v62  ;;  %v3619_v61 = vld [vmem:[#allocation8 + $0x4a8] ss:$16 sps:$4 sm:$0xff]   ;;  %v3624_v62 = vld [vmem:[#allocation8 + $0x28c] ss:$16 sps:$4 sm:$0xff]  }
 0x101   :  { %1612 = vmatprep.subr.bf16.mxu0 %v3546_v63  ;;  %1653 = vmatprep.subr.bf16.mxu1 %v3549_v0  ;;  %v3622_v63 = vld [vmem:[#allocation8 + $0x288] ss:$16 sps:$4 sm:$0xff]   ;;  %v3630_v0 = vld [vmem:[#allocation8 + $0x26c] ss:$16 sps:$4 sm:$0xff]  }
 0x104   :  { %1613 = vmatpush1.bf16.msra.mxu0 %v3544_v1  ;;  %1654 = vmatpush1.bf16.msra.mxu1 %v3547_v2  ;;  %v3628_v1 = vld [vmem:[#allocation8 + $0x268] ss:$16 sps:$4 sm:$0xff]  }
 0x105   :  { %1614 = vmatprep.subr.bf16.mxu0 %v3552_v7  ;;  %1655 = vmatprep.subr.bf16.mxu1 %v3555_v8  ;;  %v3631_v2 = vld [vmem:[#allocation8 + $0x468] ss:$16 sps:$4 sm:$0xff]   ;;  %v3636_v7 = vld [vmem:[#allocation8 + $0x24c] ss:$16 sps:$4 sm:$0xff]  }
 0x106   :  { %v3639_v8 = vld [vmem:[#allocation8 + $0x44c] ss:$16 sps:$4 sm:$0xff]  }
 0x108   :  { %1615 = vmatpush1.bf16.msra.mxu0 %v3550_v9  ;;  %1656 = vmatpush1.bf16.msra.mxu1 %v3553_v13  ;;  %v3634_v9 = vld [vmem:[#allocation8 + $0x248] ss:$16 sps:$4 sm:$0xff]  }
 0x109   :  { %1616 = vmatprep.subr.bf16.mxu0 %v3558_v14  ;;  %1657 = vmatprep.subr.bf16.mxu1 %v3561_v15  ;;  %v3637_v13 = vld [vmem:[#allocation8 + $0x448] ss:$16 sps:$4 sm:$0xff]   ;;  %v3642_v14 = vld [vmem:[#allocation8 + $0x22c] ss:$16 sps:$4 sm:$0xff]  }
 0x10a   :  { %v3645_v15 = vld [vmem:[#allocation8 + $0x42c] ss:$16 sps:$4 sm:$0xff]  }
 0x10c   :  { %1617 = vmatpush2.bf16.msra.mxu0 %v3556_v16  ;;  %1658 = vmatpush2.bf16.msra.mxu1 %v3559_v17  ;;  %v3640_v16 = vld [vmem:[#allocation8 + $0x228] ss:$16 sps:$4 sm:$0xff]  }
 0x10d   :  { %1618 = vmatprep.subr.bf16.mxu0 %v3564_v18  ;;  %1659 = vmatprep.subr.bf16.mxu1 %v3567_v21  ;;  %v3643_v17 = vld [vmem:[#allocation8 + $0x428] ss:$16 sps:$4 sm:$0xff]   ;;  %v3648_v18 = vld [vmem:[#allocation8 + $0x20c] ss:$16 sps:$4 sm:$0xff]  }
 0x10e   :  { %v3651_v21 = vld [vmem:[#allocation8 + $0x40c] ss:$16 sps:$4 sm:$0xff]  }
 0x110   :  { %1619 = vmatpush2.bf16.msra.mxu0 %v3562_v22  ;;  %1660 = vmatpush2.bf16.msra.mxu1 %v3565_v23  ;;  %v3646_v22 = vld [vmem:[#allocation8 + $0x208] ss:$16 sps:$4 sm:$0xff]  }
 0x111   :  { %1620 = vmatprep.subr.bf16.mxu0 %v3570_v24  ;;  %1661 = vmatprep.subr.bf16.mxu1 %v3573_v25  ;;  %v3649_v23 = vld [vmem:[#allocation8 + $0x408] ss:$16 sps:$4 sm:$0xff]   ;;  %v3654_v24 = vld [vmem:[#allocation8 + $0x3ec] ss:$16 sps:$4 sm:$0xff]  }
 0x112   :  { %v3657_v25 = vld [vmem:[#allocation8 + $0x5ec] ss:$16 sps:$4 sm:$0xff]  }
 0x114   :  { %1621 = vmatpush2.bf16.msra.mxu0 %v3568_v27  ;;  %1662 = vmatpush2.bf16.msra.mxu1 %v3571_v29  ;;  %v3652_v27 = vld [vmem:[#allocation8 + $0x3e8] ss:$16 sps:$4 sm:$0xff]  }
 0x115   :  { %1622 = vmatprep.subr.bf16.mxu0 %v3576_v30  ;;  %1663 = vmatprep.subr.bf16.mxu1 %v3579_v31  ;;  %v3655_v29 = vld [vmem:[#allocation8 + $0x5e8] ss:$16 sps:$4 sm:$0xff]   ;;  %v3660_v30 = vld [vmem:[#allocation8 + $0x3cc] ss:$16 sps:$4 sm:$0xff]  }
 0x116   :  { %v3663_v31 = vld [vmem:[#allocation8 + $0x5cc] ss:$16 sps:$4 sm:$0xff]  }
 0x118   :  { %1623 = vmatpush2.bf16.msra.mxu0 %v3574_v32  ;;  %1664 = vmatpush2.bf16.msra.mxu1 %v3577_v12  ;;  %v3658_v32 = vld [vmem:[#allocation8 + $0x3c8] ss:$16 sps:$4 sm:$0xff]  }
 0x119   :  { %1624 = vmatprep.subr.bf16.mxu0 %v3582_v26  ;;  %1665 = vmatprep.subr.bf16.mxu1 %v3585_v33  ;;  %v3661_v12 = vld [vmem:[#allocation8 + $0x5c8] ss:$16 sps:$4 sm:$0xff]   ;;  %v3666_v26 = vld [vmem:[#allocation8 + $0x3ac] ss:$16 sps:$4 sm:$0xff]  }
 0x11a   :  { %v3669_v33 = vld [vmem:[#allocation8 + $0x5ac] ss:$16 sps:$4 sm:$0xff]  }
 0x11c   :  { %1625 = vmatpush2.bf16.msra.mxu0 %v3580_v11  ;;  %1666 = vmatpush2.bf16.msra.mxu1 %v3583_v34  ;;  %v3664_v11 = vld [vmem:[#allocation8 + $0x3a8] ss:$16 sps:$4 sm:$0xff]  }
 0x11d   :  { %1626 = vmatprep.subr.bf16.mxu0 %v3588_v20  ;;  %1667 = vmatprep.subr.bf16.mxu1 %v3591_v35  ;;  %v3667_v34 = vld [vmem:[#allocation8 + $0x5a8] ss:$16 sps:$4 sm:$0xff]   ;;  %v3672_v20 = vld [vmem:[#allocation8 + $0x38c] ss:$16 sps:$4 sm:$0xff]  }
 0x11e   :  { %v3675_v35 = vld [vmem:[#allocation8 + $0x58c] ss:$16 sps:$4 sm:$0xff]  }
 0x120   :  { %1627 = vmatpush2.bf16.msra.mxu0 %v3586_v39  ;;  %1668 = vmatpush2.bf16.msra.mxu1 %v3589_v6  ;;  %v3670_v39 = vld [vmem:[#allocation8 + $0x388] ss:$16 sps:$4 sm:$0xff]  }
 0x121   :  { %1628 = vmatprep.subr.bf16.mxu0 %v3594_v19  ;;  %1669 = vmatprep.subr.bf16.mxu1 %v3597_v38  ;;  %v3673_v6 = vld [vmem:[#allocation8 + $0x588] ss:$16 sps:$4 sm:$0xff]   ;;  %v3678_v19 = vld [vmem:[#allocation8 + $0x36c] ss:$16 sps:$4 sm:$0xff]  }
 0x122   :  { %v3681_v38 = vld [vmem:[#allocation8 + $0x56c] ss:$16 sps:$4 sm:$0xff]  }
 0x124   :  { %1629 = vmatpush2.bf16.msra.mxu0 %v3592_v40  ;;  %1670 = vmatpush2.bf16.msra.mxu1 %v3595_v41  ;;  %v3676_v40 = vld [vmem:[#allocation8 + $0x368] ss:$16 sps:$4 sm:$0xff]  }
 0x125   :  { %1630 = vmatprep.subr.bf16.mxu0 %v3600_v42  ;;  %1671 = vmatprep.subr.bf16.mxu1 %v3603_v47  ;;  %v3679_v41 = vld [vmem:[#allocation8 + $0x568] ss:$16 sps:$4 sm:$0xff]   ;;  %v3684_v42 = vld [vmem:[#allocation8 + $0x34c] ss:$16 sps:$4 sm:$0xff]  }
 0x126   :  { %v3687_v47 = vld [vmem:[#allocation8 + $0x54c] ss:$16 sps:$4 sm:$0xff]  }
 0x128   :  { %1631 = vmatpush2.bf16.msra.mxu0 %v3598_v10  ;;  %1672 = vmatpush2.bf16.msra.mxu1 %v3601_v49  ;;  %v3682_v10 = vld [vmem:[#allocation8 + $0x348] ss:$16 sps:$4 sm:$0xff]  }
 0x129   :  { %1682 = vmatprep.subr.bf16.mxu0 %v3606_v50  ;;  %1723 = vmatprep.subr.bf16.mxu1 %v3609_v51  ;;  %v3685_v49 = vld [vmem:[#allocation8 + $0x548] ss:$16 sps:$4 sm:$0xff]   ;;  %v3690_v50 = vld [vmem:[#allocation8 + $0x32c] ss:$16 sps:$4 sm:$0xff]  }
 0x12a   :  { %v3693_v51 = vld [vmem:[#allocation8 + $0x52c] ss:$16 sps:$4 sm:$0xff]  }
 0x12b   :  { %1633 = vmatmul.mubr.bf16.vlgmr.msra.gmra.mxu0 %v4247_v53  ;;  %1674 = vmatmul.mubr.bf16.vlgmr.msra.gmra.mxu1 %v4226_v3  ;;  %v3627_v3 = vld [vmem:[#allocation8 + $0x48c] ss:$16 sps:$4 sm:$0xff]  }
 0x12c   :  { %1683 = vmatpush1.bf16.msra.mxu0 %v3604_v52  ;;  %1714 = vmatprep.mubr.bf16.mxu0 %v4224_v37  ;;  %v3625_v37 = vld [vmem:[#allocation8 + $0x488] ss:$16 sps:$4 sm:$0xff]  }
 0x12d   :  { %1724 = vmatpush1.bf16.msra.mxu1 %v3607_v54  ;;  %1755 = vmatprep.mubr.bf16.mxu1 %v4240_v46  ;;  %v3633_v46 = vld [vmem:[#allocation8 + $0x46c] ss:$16 sps:$4 sm:$0xff]   ;;  %v3688_v52 = vld [vmem:[#allocation8 + $0x328] ss:$16 sps:$4 sm:$0xff]  }
 0x12e   :  { %1684 = vmatprep.subr.bf16.mxu0 %v3612_v55  ;;  %1725 = vmatprep.subr.bf16.mxu1 %v3615_v56  ;;  %v3691_v54 = vld [vmem:[#allocation8 + $0x528] ss:$16 sps:$4 sm:$0xff]   ;;  %v3696_v55 = vld [vmem:[#allocation8 + $0x30c] ss:$16 sps:$4 sm:$0xff]  }
 0x12f   :  { %v3699_v56 = vld [vmem:[#allocation8 + $0x50c] ss:$16 sps:$4 sm:$0xff]  }
 0x130   :  { %1685 = vmatpush1.bf16.msra.mxu0 %v3610_v57  ;;  %v3694_v57 = vld [vmem:[#allocation8 + $0x308] ss:$16 sps:$4 sm:$0xff]  }
 0x131   :  { %1726 = vmatpush1.bf16.msra.mxu1 %v3613_v58  ;;  %1686 = vmatprep.subr.bf16.mxu0 %v3618_v59  ;;  %v3697_v58 = vld [vmem:[#allocation8 + $0x508] ss:$16 sps:$4 sm:$0xff]   ;;  %v3702_v59 = vld [vmem:[#allocation7 + $0xe4] ss:$16 sps:$4 sm:$0xff]  }
 0x132   :  { %1727 = vmatprep.subr.bf16.mxu1 %v3621_v36  ;;  %v3705_v36 = vld [vmem:[#allocation7 + $0x2e4] ss:$16 sps:$4 sm:$0xff]  }
 0x134   :  { %1687 = vmatpush1.bf16.msra.mxu0 %v3616_v60  ;;  %v3700_v60 = vld [vmem:[#allocation7 + $0xe0] ss:$16 sps:$4 sm:$0xff]  }
 0x135   :  { %1728 = vmatpush1.bf16.msra.mxu1 %v3619_v61  ;;  %1688 = vmatprep.subr.bf16.mxu0 %v3624_v62  ;;  %v3703_v61 = vld [vmem:[#allocation7 + $0x2e0] ss:$16 sps:$4 sm:$0xff]   ;;  %v3708_v62 = vld [vmem:[#allocation7 + $0xc4] ss:$16 sps:$4 sm:$0xff]  }
 0x136   :  { %1729 = vmatprep.subr.bf16.mxu1 %v3627_v3  ;;  %v4256_v3 = vpack.c.bf16 %v4220_v28, %v4220_v28  ;;  %v3712_v28 = vld [vmem:[#allocation7 + $0xa0] ss:$16 sps:$4 sm:$0xff]  }
 0x138   :  { %1689 = vmatpush1.bf16.msra.mxu0 %v3622_v63  ;;  %v3711_v63 = vld [vmem:[#allocation7 + $0x2c4] ss:$16 sps:$4 sm:$0xff]  }
 0x139   :  { %1730 = vmatpush1.bf16.msra.mxu1 %v3625_v37  ;;  %1690 = vmatprep.subr.bf16.mxu0 %v3630_v0  ;;  %v4261_v37 = vpack.c.bf16 %v4222_v4, %v4222_v4  ;;  %v3706_v0 = vld [vmem:[#allocation7 + $0xc0] ss:$16 sps:$4 sm:$0xff]   ;;  %v3723_v4 = vld [vmem:[#allocation7 + $0x284] ss:$16 sps:$4 sm:$0xff]  }
 0x13a   :  { %1731 = vmatprep.subr.bf16.mxu1 %v3633_v46  ;;  %v3709_v46 = vld [vmem:[#allocation7 + $0x2c0] ss:$16 sps:$4 sm:$0xff]  }
 0x13c   :  { %1691 = vmatpush1.bf16.msra.mxu0 %v3628_v1  ;;  %v3714_v1 = vld [vmem:[#allocation7 + $0xa4] ss:$16 sps:$4 sm:$0xff]  }
 0x13d   :  { %1732 = vmatpush1.bf16.msra.mxu1 %v3631_v2  ;;  %1692 = vmatprep.subr.bf16.mxu0 %v3636_v7  ;;  %v3720_v2 = vld [vmem:[#allocation7 + $0x84] ss:$16 sps:$4 sm:$0xff]   ;;  %v3718_v7 = vld [vmem:[#allocation7 + $0x80] ss:$16 sps:$4 sm:$0xff]  }
 0x13e   :  { %1733 = vmatprep.subr.bf16.mxu1 %v3639_v8  ;;  %v3721_v8 = vld [vmem:[#allocation7 + $0x280] ss:$16 sps:$4 sm:$0xff]  }
 0x140   :  { %1693 = vmatpush1.bf16.msra.mxu0 %v3634_v9  ;;  %v3726_v9 = vld [vmem:[#allocation7 + $0x64] ss:$16 sps:$4 sm:$0xff]  }
 0x141   :  { %1734 = vmatpush1.bf16.msra.mxu1 %v3637_v13  ;;  %1694 = vmatprep.subr.bf16.mxu0 %v3642_v14  ;;  %v3729_v13 = vld [vmem:[#allocation7 + $0x264] ss:$16 sps:$4 sm:$0xff]   ;;  %v3724_v14 = vld [vmem:[#allocation7 + $0x60] ss:$16 sps:$4 sm:$0xff]  }
 0x142   :  { %1735 = vmatprep.subr.bf16.mxu1 %v3645_v15  ;;  %v3727_v15 = vld [vmem:[#allocation7 + $0x260] ss:$16 sps:$4 sm:$0xff]  }
 0x144   :  { %1695 = vmatpush1.bf16.msra.mxu0 %v3640_v16  ;;  %v3732_v16 = vld [vmem:[#allocation7 + $0x44] ss:$16 sps:$4 sm:$0xff]  }
 0x145   :  { %1736 = vmatpush1.bf16.msra.mxu1 %v3643_v17  ;;  %1696 = vmatprep.subr.bf16.mxu0 %v3648_v18  ;;  %v3735_v17 = vld [vmem:[#allocation7 + $0x244] ss:$16 sps:$4 sm:$0xff]   ;;  %v3730_v18 = vld [vmem:[#allocation7 + $0x40] ss:$16 sps:$4 sm:$0xff]  }
 0x146   :  { %1737 = vmatprep.subr.bf16.mxu1 %v3651_v21  ;;  %v3733_v21 = vld [vmem:[#allocation7 + $0x240] ss:$16 sps:$4 sm:$0xff]  }
 0x148   :  { %1697 = vmatpush1.bf16.msra.mxu0 %v3646_v22  ;;  %v3738_v22 = vld [vmem:[#allocation7 + $0x24] ss:$16 sps:$4 sm:$0xff]  }
 0x149   :  { %1738 = vmatpush1.bf16.msra.mxu1 %v3649_v23  ;;  %1698 = vmatprep.subr.bf16.mxu0 %v3654_v24  ;;  %v3741_v23 = vld [vmem:[#allocation7 + $0x224] ss:$16 sps:$4 sm:$0xff]   ;;  %v3736_v24 = vld [vmem:[#allocation7 + $0x20] ss:$16 sps:$4 sm:$0xff]  }
 0x14a   :  { %1739 = vmatprep.subr.bf16.mxu1 %v3657_v25  ;;  %v3739_v25 = vld [vmem:[#allocation7 + $0x220] ss:$16 sps:$4 sm:$0xff]  }
 0x14c   :  { %1699 = vmatpush2.bf16.msra.mxu0 %v3652_v27  ;;  %v3744_v27 = vld [vmem:[#allocation7 + $0x4] ss:$16 sps:$4 sm:$0xff]  }
 0x14d   :  { %1740 = vmatpush2.bf16.msra.mxu1 %v3655_v29  ;;  %1700 = vmatprep.subr.bf16.mxu0 %v3660_v30  ;;  %v3747_v29 = vld [vmem:[#allocation7 + $0x204] ss:$16 sps:$4 sm:$0xff]   ;;  %v3742_v30 = vld [vmem:[#allocation7] ss:$16 sps:$4 sm:$0xff]  }
 0x14e   :  { %1741 = vmatprep.subr.bf16.mxu1 %v3663_v31  ;;  %v3745_v31 = vld [vmem:[#allocation7 + $0x200] ss:$16 sps:$4 sm:$0xff]  }
 0x150   :  { %1701 = vmatpush2.bf16.msra.mxu0 %v3658_v32  ;;  %v3750_v32 = vld [vmem:[#allocation7 + $0x1e4] ss:$16 sps:$4 sm:$0xff]  }
 0x151   :  { %1742 = vmatpush2.bf16.msra.mxu1 %v3661_v12  ;;  %1702 = vmatprep.subr.bf16.mxu0 %v3666_v26  ;;  %v3753_v12 = vld [vmem:[#allocation7 + $0x3e4] ss:$16 sps:$4 sm:$0xff]   ;;  %v3748_v26 = vld [vmem:[#allocation7 + $0x1e0] ss:$16 sps:$4 sm:$0xff]  }
 0x152   :  { %1743 = vmatprep.subr.bf16.mxu1 %v3669_v33  ;;  %v3751_v33 = vld [vmem:[#allocation7 + $0x3e0] ss:$16 sps:$4 sm:$0xff]  }
 0x154   :  { %1703 = vmatpush2.bf16.msra.mxu0 %v3664_v11  ;;  %v3756_v11 = vld [vmem:[#allocation7 + $0x1c4] ss:$16 sps:$4 sm:$0xff]  }
 0x155   :  { %1744 = vmatpush2.bf16.msra.mxu1 %v3667_v34  ;;  %1704 = vmatprep.subr.bf16.mxu0 %v3672_v20  ;;  %v3759_v34 = vld [vmem:[#allocation7 + $0x3c4] ss:$16 sps:$4 sm:$0xff]   ;;  %v3754_v20 = vld [vmem:[#allocation7 + $0x1c0] ss:$16 sps:$4 sm:$0xff]  }
 0x156   :  { %1745 = vmatprep.subr.bf16.mxu1 %v3675_v35  ;;  %v3757_v35 = vld [vmem:[#allocation7 + $0x3c0] ss:$16 sps:$4 sm:$0xff]  }
 0x158   :  { %1705 = vmatpush2.bf16.msra.mxu0 %v3670_v39  ;;  %v3762_v39 = vld [vmem:[#allocation7 + $0x1a4] ss:$16 sps:$4 sm:$0xff]  }
 0x159   :  { %1746 = vmatpush2.bf16.msra.mxu1 %v3673_v6  ;;  %1706 = vmatprep.subr.bf16.mxu0 %v3678_v19  ;;  %v3765_v6 = vld [vmem:[#allocation7 + $0x3a4] ss:$16 sps:$4 sm:$0xff]   ;;  %v3760_v19 = vld [vmem:[#allocation7 + $0x1a0] ss:$16 sps:$4 sm:$0xff]  }
 0x15a   :  { %1747 = vmatprep.subr.bf16.mxu1 %v3681_v38  ;;  %v3763_v38 = vld [vmem:[#allocation7 + $0x3a0] ss:$16 sps:$4 sm:$0xff]  }
 0x15c   :  { %1707 = vmatpush2.bf16.msra.mxu0 %v3676_v40  ;;  %v3768_v40 = vld [vmem:[#allocation7 + $0x184] ss:$16 sps:$4 sm:$0xff]  }
 0x15d   :  { %1748 = vmatpush2.bf16.msra.mxu1 %v3679_v41  ;;  %1708 = vmatprep.subr.bf16.mxu0 %v3684_v42  ;;  %v3771_v41 = vld [vmem:[#allocation7 + $0x384] ss:$16 sps:$4 sm:$0xff]   ;;  %v3766_v42 = vld [vmem:[#allocation7 + $0x180] ss:$16 sps:$4 sm:$0xff]  }
 0x15e   :  { %1749 = vmatprep.subr.bf16.mxu1 %v3687_v47  ;;  %v3769_v47 = vld [vmem:[#allocation7 + $0x380] ss:$16 sps:$4 sm:$0xff]  }
 0x160   :  { %1709 = vmatpush2.bf16.msra.mxu0 %v3682_v10  ;;  %v3774_v10 = vld [vmem:[#allocation7 + $0x164] ss:$16 sps:$4 sm:$0xff]  }
 0x161   :  { %1750 = vmatpush2.bf16.msra.mxu1 %v3685_v49  ;;  %1710 = vmatprep.subr.bf16.mxu0 %v3690_v50  ;;  %v3777_v49 = vld [vmem:[#allocation7 + $0x364] ss:$16 sps:$4 sm:$0xff]   ;;  %v3772_v50 = vld [vmem:[#allocation7 + $0x160] ss:$16 sps:$4 sm:$0xff]  }
 0x162   :  { %1751 = vmatprep.subr.bf16.mxu1 %v3693_v51  ;;  %v3775_v51 = vld [vmem:[#allocation7 + $0x360] ss:$16 sps:$4 sm:$0xff]  }
 0x164   :  { %1711 = vmatpush2.bf16.msra.mxu0 %v3688_v52  ;;  %v3780_v52 = vld [vmem:[#allocation7 + $0x144] ss:$16 sps:$4 sm:$0xff]  }
 0x165   :  { %1752 = vmatpush2.bf16.msra.mxu1 %v3691_v54  ;;  %1712 = vmatprep.subr.bf16.mxu0 %v3696_v55  ;;  %v3783_v54 = vld [vmem:[#allocation7 + $0x344] ss:$16 sps:$4 sm:$0xff]   ;;  %v3778_v55 = vld [vmem:[#allocation7 + $0x140] ss:$16 sps:$4 sm:$0xff]  }
 0x166   :  { %1753 = vmatprep.subr.bf16.mxu1 %v3699_v56  ;;  %v3781_v56 = vld [vmem:[#allocation7 + $0x340] ss:$16 sps:$4 sm:$0xff]  }
 0x168   :  { %1713 = vmatpush2.bf16.msra.mxu0 %v3694_v57  ;;  %v3786_v57 = vld [vmem:[#allocation7 + $0x124] ss:$16 sps:$4 sm:$0xff]  }
 0x169   :  { %1754 = vmatpush2.bf16.msra.mxu1 %v3697_v58  ;;  %2724 = vmatprep.subr.bf16.mxu0 %v3702_v59  ;;  %v3789_v58 = vld [vmem:[#allocation7 + $0x324] ss:$16 sps:$4 sm:$0xff]   ;;  %v3784_v59 = vld [vmem:[#allocation7 + $0x120] ss:$16 sps:$4 sm:$0xff]  }
 0x16a   :  { %2765 = vmatprep.subr.bf16.mxu1 %v3705_v36  ;;  %v3787_v36 = vld [vmem:[#allocation7 + $0x320] ss:$16 sps:$4 sm:$0xff]  }
 0x16b   :  { %1715 = vmatmul.mubr.bf16.vlgmr.msra.gmra.mxu0 %v4228_v5  ;;  %v3717_v5 = vld [vmem:[#allocation7 + $0x2a4] ss:$16 sps:$4 sm:$0xff]  }
 0x16c   :  { %1756 = vmatmul.mubr.bf16.vlgmr.msra.gmra.mxu1 %v4247_v53  ;;  %2725 = vmatpush1.bf16.msra.mxu0 %v3700_v60  ;;  %v3715_v53 = vld [vmem:[#allocation7 + $0x2a0] ss:$16 sps:$4 sm:$0xff]   ;;  %v3792_v60 = vld [vmem:[#allocation7 + $0x104] ss:$16 sps:$4 sm:$0xff]  }
 0x16d   :  { %2756 = vmatprep.mubr.bf16.mxu0 %v4256_v3  ;;  %2766 = vmatpush1.bf16.msra.mxu1 %v3703_v61  ;;  %v3795_v61 = vld [vmem:[#allocation7 + $0x304] ss:$16 sps:$4 sm:$0xff]  }
 0x16e   :  { %2797 = vmatprep.mubr.bf16.mxu1 %v4261_v37  ;;  %2726 = vmatprep.subr.bf16.mxu0 %v3708_v62  ;;  %v3790_v62 = vld [vmem:[#allocation7 + $0x100] ss:$16 sps:$4 sm:$0xff]  }
 0x16f   :  { %2767 = vmatprep.subr.bf16.mxu1 %v3711_v63  ;;  %v3793_v63 = vld [vmem:[#allocation7 + $0x300] ss:$16 sps:$4 sm:$0xff]  }
 0x170   :  { %2727 = vmatpush1.bf16.msra.mxu0 %v3706_v0  ;;  %v3798_v0 = vld [vmem:[#allocation7 + $0x4e4] ss:$16 sps:$4 sm:$0xff]  }
 0x171   :  { %2768 = vmatpush1.bf16.msra.mxu1 %v3709_v46  ;;  %2728 = vmatprep.subr.bf16.mxu0 %v3714_v1  ;;  %v3801_v46 = vld [vmem:[#allocation7 + $0xec] ss:$16 sps:$4 sm:$0xff]   ;;  %v3796_v1 = vld [vmem:[#allocation7 + $0x4e0] ss:$16 sps:$4 sm:$0xff]  }
 0x172   :  { %2769 = vmatprep.subr.bf16.mxu1 %v3717_v5  ;;  %v4267_v5 = vpack.c.bf16 %v4232_v43, %v4232_v43 }
 0x174   :  { %2729 = vmatpush1.bf16.msra.mxu0 %v3712_v28  ;;  %v3799_v28 = vld [vmem:[#allocation7 + $0xe8] ss:$16 sps:$4 sm:$0xff]  }
 0x175   :  { %2770 = vmatpush1.bf16.msra.mxu1 %v3715_v53  ;;  %2730 = vmatprep.subr.bf16.mxu0 %v3720_v2  ;;  %v4271_v53 = vpack.c.bf16 %v4234_v44, %v4234_v44  ;;  %v3804_v2 = vld [vmem:[#allocation7 + $0x4c4] ss:$16 sps:$4 sm:$0xff]  }
 0x176   :  { %2771 = vmatprep.subr.bf16.mxu1 %v3723_v4 }
 0x178   :  { %2731 = vmatpush1.bf16.msra.mxu0 %v3718_v7 }
 0x179   :  { %2772 = vmatpush1.bf16.msra.mxu1 %v3721_v8  ;;  %2732 = vmatprep.subr.bf16.mxu0 %v3726_v9  ;;  %v4276_v8 = vpack.c.bf16 %v4236_v45, %v4236_v45  ;;  %v3807_v9 = vld [vmem:[#allocation7 + $0xcc] ss:$16 sps:$4 sm:$0xff]  }
 0x17a   :  { %2773 = vmatprep.subr.bf16.mxu1 %v3729_v13  ;;  %v3802_v13 = vld [vmem:[#allocation7 + $0x4c0] ss:$16 sps:$4 sm:$0xff]   ;;  %v3813_v45 = vld [vmem:[#allocation7 + $0xac] ss:$16 sps:$4 sm:$0xff]  }
 0x17c   :  { %2733 = vmatpush1.bf16.msra.mxu0 %v3724_v14 }
 0x17d   :  { %2774 = vmatpush1.bf16.msra.mxu1 %v3727_v15  ;;  %2734 = vmatprep.subr.bf16.mxu0 %v3732_v16  ;;  %v3805_v15 = vld [vmem:[#allocation7 + $0xc8] ss:$16 sps:$4 sm:$0xff]   ;;  %v3810_v16 = vld [vmem:[#allocation7 + $0x4a4] ss:$16 sps:$4 sm:$0xff]  }
 0x17e   :  { %2775 = vmatprep.subr.bf16.mxu1 %v3735_v17 }
 0x180   :  { %2735 = vmatpush1.bf16.msra.mxu0 %v3730_v18 }
 0x181   :  { %2776 = vmatpush1.bf16.msra.mxu1 %v3733_v21  ;;  %2736 = vmatprep.subr.bf16.mxu0 %v3738_v22  ;;  %v3808_v22 = vld [vmem:[#allocation7 + $0x4a0] ss:$16 sps:$4 sm:$0xff]  }
 0x182   :  { %2777 = vmatprep.subr.bf16.mxu1 %v3741_v23 }
 0x184   :  { %2737 = vmatpush1.bf16.msra.mxu0 %v3736_v24 }
 0x185   :  { %2778 = vmatpush1.bf16.msra.mxu1 %v3739_v25  ;;  %2738 = vmatprep.subr.bf16.mxu0 %v3744_v27  ;;  %v3811_v25 = vld [vmem:[#allocation7 + $0xa8] ss:$16 sps:$4 sm:$0xff]   ;;  %v3816_v27 = vld [vmem:[#allocation7 + $0x484] ss:$16 sps:$4 sm:$0xff]  }
 0x186   :  { %2779 = vmatprep.subr.bf16.mxu1 %v3747_v29  ;;  %v3819_v29 = vld [vmem:[#allocation7 + $0x8c] ss:$16 sps:$4 sm:$0xff]  }
 0x188   :  { %2739 = vmatpush1.bf16.msra.mxu0 %v3742_v30  ;;  %v3814_v30 = vld [vmem:[#allocation7 + $0x480] ss:$16 sps:$4 sm:$0xff]  }
 0x189   :  { %2780 = vmatpush1.bf16.msra.mxu1 %v3745_v31  ;;  %2740 = vmatprep.subr.bf16.mxu0 %v3750_v32  ;;  %v3822_v31 = vld [vmem:[#allocation7 + $0x464] ss:$16 sps:$4 sm:$0xff]   ;;  %v3825_v32 = vld [vmem:[#allocation7 + $0x6c] ss:$16 sps:$4 sm:$0xff]  }
 0x18a   :  { %2781 = vmatprep.subr.bf16.mxu1 %v3753_v12  ;;  %v3820_v12 = vld [vmem:[#allocation7 + $0x460] ss:$16 sps:$4 sm:$0xff]  }
 0x18c   :  { %2741 = vmatpush2.bf16.msra.mxu0 %v3748_v26  ;;  %v3823_v26 = vld [vmem:[#allocation7 + $0x68] ss:$16 sps:$4 sm:$0xff]  }
 0x18d   :  { %2782 = vmatpush2.bf16.msra.mxu1 %v3751_v33  ;;  %2742 = vmatprep.subr.bf16.mxu0 %v3756_v11  ;;  %v3828_v33 = vld [vmem:[#allocation7 + $0x444] ss:$16 sps:$4 sm:$0xff]   ;;  %v3831_v11 = vld [vmem:[#allocation7 + $0x4c] ss:$16 sps:$4 sm:$0xff]  }
 0x18e   :  { %2783 = vmatprep.subr.bf16.mxu1 %v3759_v34  ;;  %v3826_v34 = vld [vmem:[#allocation7 + $0x440] ss:$16 sps:$4 sm:$0xff]  }
 0x190   :  { %2743 = vmatpush2.bf16.msra.mxu0 %v3754_v20  ;;  %v3829_v20 = vld [vmem:[#allocation7 + $0x48] ss:$16 sps:$4 sm:$0xff]  }
 0x191   :  { %2784 = vmatpush2.bf16.msra.mxu1 %v3757_v35  ;;  %2744 = vmatprep.subr.bf16.mxu0 %v3762_v39  ;;  %v3834_v35 = vld [vmem:[#allocation7 + $0x424] ss:$16 sps:$4 sm:$0xff]   ;;  %v3837_v39 = vld [vmem:[#allocation7 + $0x2c] ss:$16 sps:$4 sm:$0xff]  }
 0x192   :  { %2785 = vmatprep.subr.bf16.mxu1 %v3765_v6  ;;  %v3832_v6 = vld [vmem:[#allocation7 + $0x420] ss:$16 sps:$4 sm:$0xff]  }
 0x194   :  { %2745 = vmatpush2.bf16.msra.mxu0 %v3760_v19  ;;  %v3835_v19 = vld [vmem:[#allocation7 + $0x28] ss:$16 sps:$4 sm:$0xff]  }
 0x195   :  { %2786 = vmatpush2.bf16.msra.mxu1 %v3763_v38  ;;  %2746 = vmatprep.subr.bf16.mxu0 %v3768_v40  ;;  %v3840_v38 = vld [vmem:[#allocation7 + $0x404] ss:$16 sps:$4 sm:$0xff]   ;;  %v3843_v40 = vld [vmem:[#allocation7 + $0xc] ss:$16 sps:$4 sm:$0xff]  }
 0x196   :  { %2787 = vmatprep.subr.bf16.mxu1 %v3771_v41  ;;  %v3838_v41 = vld [vmem:[#allocation7 + $0x400] ss:$16 sps:$4 sm:$0xff]  }
 0x198   :  { %2747 = vmatpush2.bf16.msra.mxu0 %v3766_v42  ;;  %v3841_v42 = vld [vmem:[#allocation7 + $0x8] ss:$16 sps:$4 sm:$0xff]  }
 0x199   :  { %2788 = vmatpush2.bf16.msra.mxu1 %v3769_v47  ;;  %2748 = vmatprep.subr.bf16.mxu0 %v3774_v10  ;;  %v3846_v47 = vld [vmem:[#allocation7 + $0x5e4] ss:$16 sps:$4 sm:$0xff]   ;;  %v3849_v10 = vld [vmem:[#allocation7 + $0x1ec] ss:$16 sps:$4 sm:$0xff]  }
 0x19a   :  { %2789 = vmatprep.subr.bf16.mxu1 %v3777_v49  ;;  %v3844_v49 = vld [vmem:[#allocation7 + $0x5e0] ss:$16 sps:$4 sm:$0xff]  }
 0x19c   :  { %2749 = vmatpush2.bf16.msra.mxu0 %v3772_v50  ;;  %v3847_v50 = vld [vmem:[#allocation7 + $0x1e8] ss:$16 sps:$4 sm:$0xff]  }
 0x19d   :  { %2790 = vmatpush2.bf16.msra.mxu1 %v3775_v51  ;;  %2750 = vmatprep.subr.bf16.mxu0 %v3780_v52  ;;  %v3852_v51 = vld [vmem:[#allocation7 + $0x5c4] ss:$16 sps:$4 sm:$0xff]   ;;  %v3855_v52 = vld [vmem:[#allocation7 + $0x1cc] ss:$16 sps:$4 sm:$0xff]  }
 0x19e   :  { %2791 = vmatprep.subr.bf16.mxu1 %v3783_v54  ;;  %v3850_v54 = vld [vmem:[#allocation7 + $0x5c0] ss:$16 sps:$4 sm:$0xff]  }
 0x1a0   :  { %2751 = vmatpush2.bf16.msra.mxu0 %v3778_v55  ;;  %v3853_v55 = vld [vmem:[#allocation7 + $0x1c8] ss:$16 sps:$4 sm:$0xff]  }
 0x1a1   :  { %2792 = vmatpush2.bf16.msra.mxu1 %v3781_v56  ;;  %2752 = vmatprep.subr.bf16.mxu0 %v3786_v57  ;;  %v3858_v56 = vld [vmem:[#allocation7 + $0x5a4] ss:$16 sps:$4 sm:$0xff]   ;;  %v3861_v57 = vld [vmem:[#allocation7 + $0x1ac] ss:$16 sps:$4 sm:$0xff]  }
 0x1a2   :  { %2793 = vmatprep.subr.bf16.mxu1 %v3789_v58  ;;  %v3856_v58 = vld [vmem:[#allocation7 + $0x5a0] ss:$16 sps:$4 sm:$0xff]  }
 0x1a4   :  { %2753 = vmatpush2.bf16.msra.mxu0 %v3784_v59  ;;  %v3859_v59 = vld [vmem:[#allocation7 + $0x1a8] ss:$16 sps:$4 sm:$0xff]  }
 0x1a5   :  { %2794 = vmatpush2.bf16.msra.mxu1 %v3787_v36  ;;  %2754 = vmatprep.subr.bf16.mxu0 %v3792_v60  ;;  %v3864_v36 = vld [vmem:[#allocation7 + $0x584] ss:$16 sps:$4 sm:$0xff]   ;;  %v3867_v60 = vld [vmem:[#allocation7 + $0x18c] ss:$16 sps:$4 sm:$0xff]  }
 0x1a6   :  { %2795 = vmatprep.subr.bf16.mxu1 %v3795_v61  ;;  %v3862_v61 = vld [vmem:[#allocation7 + $0x580] ss:$16 sps:$4 sm:$0xff]  }
 0x1a8   :  { %2755 = vmatpush2.bf16.msra.mxu0 %v3790_v62  ;;  %v3865_v62 = vld [vmem:[#allocation7 + $0x188] ss:$16 sps:$4 sm:$0xff]  }
 0x1a9   :  { %2796 = vmatpush2.bf16.msra.mxu1 %v3793_v63  ;;  %2806 = vmatprep.subr.bf16.mxu0 %v3798_v0  ;;  %v3870_v63 = vld [vmem:[#allocation7 + $0x564] ss:$16 sps:$4 sm:$0xff]   ;;  %v3873_v0 = vld [vmem:[#allocation7 + $0x16c] ss:$16 sps:$4 sm:$0xff]  }
 0x1aa   :  { %2847 = vmatprep.subr.bf16.mxu1 %v3801_v46  ;;  %v3868_v46 = vld [vmem:[#allocation7 + $0x560] ss:$16 sps:$4 sm:$0xff]  }
 0x1ab   :  { %2757 = vmatmul.mubr.bf16.vlgmr.msra.gmra.mxu0 %v4267_v5  ;;  %v1552_v4 = vpop.f32.mrf.mxu0  ;;  %v1593_v7 = vpop.f32.mrf.mxu1 }
 0x1ac   :  { %2798 = vmatmul.mubr.bf16.vlgmr.msra.gmra.mxu1 %v4271_v53  ;;  %v4279_v43 = vadd.f32 %v1593_v7, %v1552_v4  ;;  %2807 = vmatpush1.bf16.msra.mxu0 %v3796_v1  ;;  %v3871_v1 = vld [vmem:[#allocation7 + $0x168] ss:$16 sps:$4 sm:$0xff]   ;;  %v3874_v4 = vld [vmem:[#allocation7 + $0x540] ss:$16 sps:$4 sm:$0xff]  }
 0x1ad   :  { %2838 = vmatprep.mubr.bf16.mxu0 %v4276_v8  ;;  %2848 = vmatpush1.bf16.msra.mxu1 %v3799_v28  ;;  %v1554_v44 = vpop.f32.mrf.mxu0  ;;  %v1595_v14 = vpop.f32.mrf.mxu1  ;;  %v3876_v28 = vld [vmem:[#allocation7 + $0x544] ss:$16 sps:$4 sm:$0xff]   ;;  %v3877_v7 = vld [vmem:[#allocation7 + $0x148] ss:$16 sps:$4 sm:$0xff]  }
 0x1ae   :  { %2879 = vmatprep.mubr.bf16.mxu1 %v4256_v3  ;;  %v4283_v17 = vadd.f32 %v1595_v14, %v1554_v44  ;;  %2808 = vmatprep.subr.bf16.mxu0 %v3804_v2  ;;  %v3817_v3 = vld [vmem:[#allocation7 + $0x88] ss:$16 sps:$4 sm:$0xff]   ;;  %v3879_v2 = vld [vmem:[#allocation7 + $0x14c] ss:$16 sps:$4 sm:$0xff]   ;;  %v3880_v44 = vld [vmem:[#allocation7 + $0x520] ss:$16 sps:$4 sm:$0xff]  }
 0x1af   :  { %2849 = vmatprep.subr.bf16.mxu1 %v3807_v9  ;;  %v1556_v18 = vpop.f32.mrf.mxu0  ;;  %v1597_v21 = vpop.f32.mrf.mxu1  ;;  %v3882_v9 = vld [vmem:[#allocation7 + $0x524] ss:$16 sps:$4 sm:$0xff]   ;;  %v3883_v14 = vld [vmem:[#allocation7 + $0x128] ss:$16 sps:$4 sm:$0xff]  }
 0x1b0   :  { %2809 = vmatpush1.bf16.msra.mxu0 %v3802_v13  ;;  %v3885_v13 = vld [vmem:[#allocation7 + $0x12c] ss:$16 sps:$4 sm:$0xff]   ;;  %v3889_v18 = vld [vmem:[#allocation7 + $0x108] ss:$16 sps:$4 sm:$0xff]  }
 0x1b1   :  { %2850 = vmatpush1.bf16.msra.mxu1 %v3805_v15  ;;  %v1557_v23 = vpop.f32.mrf.mxu0  ;;  %v1598_v24 = vpop.f32.mrf.mxu1  ;;  %2810 = vmatprep.subr.bf16.mxu0 %v3810_v16  ;;  %v3888_v15 = vld [vmem:[#allocation7 + $0x504] ss:$16 sps:$4 sm:$0xff]   ;;  %v3891_v16 = vld [vmem:[#allocation7 + $0x10c] ss:$16 sps:$4 sm:$0xff]  }
 0x1b2   :  { %2851 = vmatprep.subr.bf16.mxu1 %v3813_v45  ;;  %v3886_v45 = vld [vmem:[#allocation7 + $0x500] ss:$16 sps:$4 sm:$0xff]   ;;  %v3894_v21 = vld [vmem:[#allocation7 + $0x2ec] ss:$16 sps:$4 sm:$0xff]   ;;  %v3892_v23 = vld [vmem:[#allocation7 + $0x2e8] ss:$16 sps:$4 sm:$0xff]   ;;  %v4287_v24 = vpack.c.bf16 %v4242_v48, %v4242_v48 }
 0x1b4   :  { %2811 = vmatpush1.bf16.msra.mxu0 %v3808_v22  ;;  %v3897_v22 = vld [vmem:[#allocation7 + $0x4ec] ss:$16 sps:$4 sm:$0xff]  }
 0x1b5   :  { %2852 = vmatpush1.bf16.msra.mxu1 %v3811_v25  ;;  %2812 = vmatprep.subr.bf16.mxu0 %v3816_v27  ;;  %v3895_v25 = vld [vmem:[#allocation7 + $0x4e8] ss:$16 sps:$4 sm:$0xff]   ;;  %v3900_v27 = vld [vmem:[#allocation7 + $0x2cc] ss:$16 sps:$4 sm:$0xff]  }
 0x1b6   :  { %2853 = vmatprep.subr.bf16.mxu1 %v3819_v29 }
 0x1b8   :  { %2813 = vmatpush1.bf16.msra.mxu0 %v3814_v30 }
 0x1b9   :  { %2854 = vmatpush1.bf16.msra.mxu1 %v3817_v3  ;;  %2814 = vmatprep.subr.bf16.mxu0 %v3822_v31  ;;  %v3903_v3 = vld [vmem:[#allocation7 + $0x4cc] ss:$16 sps:$4 sm:$0xff]  }
 0x1ba   :  { %2855 = vmatprep.subr.bf16.mxu1 %v3825_v32  ;;  %v3898_v32 = vld [vmem:[#allocation7 + $0x2c8] ss:$16 sps:$4 sm:$0xff]  }
 0x1bc   :  { %2815 = vmatpush1.bf16.msra.mxu0 %v3820_v12 }
 0x1bd   :  { %2856 = vmatpush1.bf16.msra.mxu1 %v3823_v26  ;;  %2816 = vmatprep.subr.bf16.mxu0 %v3828_v33  ;;  %v3901_v26 = vld [vmem:[#allocation7 + $0x4c8] ss:$16 sps:$4 sm:$0xff]   ;;  %v3906_v33 = vld [vmem:[#allocation7 + $0x2ac] ss:$16 sps:$4 sm:$0xff]  }
 0x1be   :  { %2857 = vmatprep.subr.bf16.mxu1 %v3831_v11 }
 0x1c0   :  { %2817 = vmatpush1.bf16.msra.mxu0 %v3826_v34 }
 0x1c1   :  { %2858 = vmatpush1.bf16.msra.mxu1 %v3829_v20  ;;  %2818 = vmatprep.subr.bf16.mxu0 %v3834_v35 }
 0x1c2   :  { %2859 = vmatprep.subr.bf16.mxu1 %v3837_v39  ;;  %v3907_v39 = vld [vmem:[#allocation7 + $0x4a8] ss:$16 sps:$4 sm:$0xff]  }
 0x1c4   :  { %2819 = vmatpush1.bf16.msra.mxu0 %v3832_v6  ;;  %v3912_v6 = vld [vmem:[#allocation7 + $0x28c] ss:$16 sps:$4 sm:$0xff]  }
 0x1c5   :  { %2860 = vmatpush1.bf16.msra.mxu1 %v3835_v19  ;;  %2820 = vmatprep.subr.bf16.mxu0 %v3840_v38  ;;  %v3915_v19 = vld [vmem:[#allocation7 + $0x48c] ss:$16 sps:$4 sm:$0xff]  }
 0x1c6   :  { %2861 = vmatprep.subr.bf16.mxu1 %v3843_v40  ;;  %v3918_v38 = vld [vmem:[#allocation7 + $0x26c] ss:$16 sps:$4 sm:$0xff]  }
 0x1c7   :  { %v3921_v40 = vld [vmem:[#allocation7 + $0x46c] ss:$16 sps:$4 sm:$0xff]  }
 0x1c8   :  { %2821 = vmatpush1.bf16.msra.mxu0 %v3838_v41  ;;  %v3916_v41 = vld [vmem:[#allocation7 + $0x268] ss:$16 sps:$4 sm:$0xff]  }
 0x1c9   :  { %2862 = vmatpush1.bf16.msra.mxu1 %v3841_v42  ;;  %2822 = vmatprep.subr.bf16.mxu0 %v3846_v47  ;;  %v3919_v42 = vld [vmem:[#allocation7 + $0x468] ss:$16 sps:$4 sm:$0xff]   ;;  %v3924_v47 = vld [vmem:[#allocation7 + $0x24c] ss:$16 sps:$4 sm:$0xff]  }
 0x1ca   :  { %2863 = vmatprep.subr.bf16.mxu1 %v3849_v10  ;;  %v3927_v10 = vld [vmem:[#allocation7 + $0x44c] ss:$16 sps:$4 sm:$0xff]  }
 0x1cc   :  { %2823 = vmatpush2.bf16.msra.mxu0 %v3844_v49  ;;  %v3922_v49 = vld [vmem:[#allocation7 + $0x248] ss:$16 sps:$4 sm:$0xff]  }
 0x1cd   :  { %2864 = vmatpush2.bf16.msra.mxu1 %v3847_v50  ;;  %2824 = vmatprep.subr.bf16.mxu0 %v3852_v51  ;;  %v3925_v50 = vld [vmem:[#allocation7 + $0x448] ss:$16 sps:$4 sm:$0xff]   ;;  %v3930_v51 = vld [vmem:[#allocation7 + $0x22c] ss:$16 sps:$4 sm:$0xff]  }
 0x1ce   :  { %2865 = vmatprep.subr.bf16.mxu1 %v3855_v52  ;;  %v3933_v52 = vld [vmem:[#allocation7 + $0x42c] ss:$16 sps:$4 sm:$0xff]  }
 0x1d0   :  { %2825 = vmatpush2.bf16.msra.mxu0 %v3850_v54  ;;  %v3928_v54 = vld [vmem:[#allocation7 + $0x228] ss:$16 sps:$4 sm:$0xff]  }
 0x1d1   :  { %2866 = vmatpush2.bf16.msra.mxu1 %v3853_v55  ;;  %2826 = vmatprep.subr.bf16.mxu0 %v3858_v56  ;;  %v3931_v55 = vld [vmem:[#allocation7 + $0x428] ss:$16 sps:$4 sm:$0xff]   ;;  %v3936_v56 = vld [vmem:[#allocation7 + $0x20c] ss:$16 sps:$4 sm:$0xff]  }
 0x1d2   :  { %2867 = vmatprep.subr.bf16.mxu1 %v3861_v57  ;;  %v3939_v57 = vld [vmem:[#allocation7 + $0x40c] ss:$16 sps:$4 sm:$0xff]  }
 0x1d4   :  { %2827 = vmatpush2.bf16.msra.mxu0 %v3856_v58  ;;  %v3934_v58 = vld [vmem:[#allocation7 + $0x208] ss:$16 sps:$4 sm:$0xff]  }
 0x1d5   :  { %2868 = vmatpush2.bf16.msra.mxu1 %v3859_v59  ;;  %2828 = vmatprep.subr.bf16.mxu0 %v3864_v36  ;;  %v3937_v59 = vld [vmem:[#allocation7 + $0x408] ss:$16 sps:$4 sm:$0xff]   ;;  %v3942_v36 = vld [vmem:[#allocation7 + $0x3ec] ss:$16 sps:$4 sm:$0xff]  }
 0x1d6   :  { %2869 = vmatprep.subr.bf16.mxu1 %v3867_v60  ;;  %v3945_v60 = vld [vmem:[#allocation7 + $0x5ec] ss:$16 sps:$4 sm:$0xff]  }
 0x1d8   :  { %2829 = vmatpush2.bf16.msra.mxu0 %v3862_v61  ;;  %v3940_v61 = vld [vmem:[#allocation7 + $0x3e8] ss:$16 sps:$4 sm:$0xff]  }
 0x1d9   :  { %2870 = vmatpush2.bf16.msra.mxu1 %v3865_v62  ;;  %2830 = vmatprep.subr.bf16.mxu0 %v3870_v63  ;;  %v3943_v62 = vld [vmem:[#allocation7 + $0x5e8] ss:$16 sps:$4 sm:$0xff]   ;;  %v3948_v63 = vld [vmem:[#allocation7 + $0x3cc] ss:$16 sps:$4 sm:$0xff]  }
 0x1da   :  { %2871 = vmatprep.subr.bf16.mxu1 %v3873_v0  ;;  %v3951_v0 = vld [vmem:[#allocation7 + $0x5cc] ss:$16 sps:$4 sm:$0xff]  }
 0x1dc   :  { %2831 = vmatpush2.bf16.msra.mxu0 %v3868_v46  ;;  %v3946_v46 = vld [vmem:[#allocation7 + $0x3c8] ss:$16 sps:$4 sm:$0xff]  }
 0x1dd   :  { %2872 = vmatpush2.bf16.msra.mxu1 %v3871_v1  ;;  %2832 = vmatprep.subr.bf16.mxu0 %v3876_v28  ;;  %v3949_v1 = vld [vmem:[#allocation7 + $0x5c8] ss:$16 sps:$4 sm:$0xff]   ;;  %v3954_v28 = vld [vmem:[#allocation7 + $0x3ac] ss:$16 sps:$4 sm:$0xff]  }
 0x1de   :  { %2873 = vmatprep.subr.bf16.mxu1 %v3879_v2  ;;  %v3957_v2 = vld [vmem:[#allocation7 + $0x5ac] ss:$16 sps:$4 sm:$0xff]  }
 0x1e0   :  { %2833 = vmatpush2.bf16.msra.mxu0 %v3874_v4  ;;  %v3952_v4 = vld [vmem:[#allocation7 + $0x3a8] ss:$16 sps:$4 sm:$0xff]  }
 0x1e1   :  { %2874 = vmatpush2.bf16.msra.mxu1 %v3877_v7  ;;  %2834 = vmatprep.subr.bf16.mxu0 %v3882_v9  ;;  %v3955_v7 = vld [vmem:[#allocation7 + $0x5a8] ss:$16 sps:$4 sm:$0xff]   ;;  %v3960_v9 = vld [vmem:[#allocation7 + $0x38c] ss:$16 sps:$4 sm:$0xff]  }
 0x1e2   :  { %2875 = vmatprep.subr.bf16.mxu1 %v3885_v13  ;;  %v3963_v13 = vld [vmem:[#allocation7 + $0x58c] ss:$16 sps:$4 sm:$0xff]  }
 0x1e4   :  { %2835 = vmatpush2.bf16.msra.mxu0 %v3880_v44  ;;  %v3958_v44 = vld [vmem:[#allocation7 + $0x388] ss:$16 sps:$4 sm:$0xff]  }
 0x1e5   :  { %2876 = vmatpush2.bf16.msra.mxu1 %v3883_v14  ;;  %2836 = vmatprep.subr.bf16.mxu0 %v3888_v15  ;;  %v3961_v14 = vld [vmem:[#allocation7 + $0x588] ss:$16 sps:$4 sm:$0xff]   ;;  %v3966_v15 = vld [vmem:[#allocation7 + $0x36c] ss:$16 sps:$4 sm:$0xff]  }
 0x1e6   :  { %2877 = vmatprep.subr.bf16.mxu1 %v3891_v16  ;;  %v3969_v16 = vld [vmem:[#allocation7 + $0x56c] ss:$16 sps:$4 sm:$0xff]  }
 0x1e8   :  { %2837 = vmatpush2.bf16.msra.mxu0 %v3886_v45  ;;  %v3964_v45 = vld [vmem:[#allocation7 + $0x368] ss:$16 sps:$4 sm:$0xff]  }
 0x1e9   :  { %2878 = vmatpush2.bf16.msra.mxu1 %v3889_v18  ;;  %2888 = vmatprep.subr.bf16.mxu0 %v3894_v21  ;;  %v3967_v18 = vld [vmem:[#allocation7 + $0x568] ss:$16 sps:$4 sm:$0xff]   ;;  %v3972_v21 = vld [vmem:[#allocation7 + $0x34c] ss:$16 sps:$4 sm:$0xff]  }
 0x1ea   :  { %2929 = vmatprep.subr.bf16.mxu1 %v3897_v22  ;;  %v3975_v22 = vld [vmem:[#allocation7 + $0x54c] ss:$16 sps:$4 sm:$0xff]  }
 0x1eb   :  { %v1634_v29 = vpop.f32.mrf.mxu0  ;;  %v4289_v30 = vpop.f32.mrf.mxu1  ;;  %2839 = vmatmul.mubr.bf16.vlgmr.msra.gmra.mxu0 %v4287_v24 }
 0x1ec   :  { %v4293_v31 = vadd.f32 %v1634_v29, %v4279_v43  ;;  %2880 = vmatmul.mubr.bf16.vlgmr.msra.gmra.mxu1 %v4267_v5  ;;  %2889 = vmatpush1.bf16.msra.mxu0 %v3892_v23  ;;  %v3909_v43 = vld [vmem:[#allocation7 + $0x4ac] ss:$16 sps:$4 sm:$0xff]   ;;  %v3904_v5 = vld [vmem:[#allocation7 + $0x2a8] ss:$16 sps:$4 sm:$0xff]  }
 0x1ed   :  { %2920 = vmatprep.mubr.bf16.mxu0 %v4261_v37  ;;  %2930 = vmatpush1.bf16.msra.mxu1 %v3895_v25  ;;  %v1636_v48 = vpop.f32.mrf.mxu0  ;;  %v4297_v12 = vpop.f32.mrf.mxu1  ;;  %v3970_v23 = vld [vmem:[#allocation7 + $0x348] ss:$16 sps:$4 sm:$0xff]   ;;  %v3981_v29 = vld [vmem:[#allocation7 + $0x52c] ss:$16 sps:$4 sm:$0xff]  }
 0x1ee   :  { %2961 = vmatprep.mubr.bf16.mxu1 %v4276_v8  ;;  %v4301_v11 = vadd.f32 %v1636_v48, %v4283_v17  ;;  %2890 = vmatprep.subr.bf16.mxu0 %v3900_v27  ;;  %v3910_v8 = vld [vmem:[#allocation7 + $0x288] ss:$16 sps:$4 sm:$0xff]   ;;  %v3978_v27 = vld [vmem:[#allocation7 + $0x32c] ss:$16 sps:$4 sm:$0xff]  }
 0x1ef   :  { %v1638_v34 = vpop.f32.mrf.mxu0  ;;  %v1679_v20 = vpop.f32.mrf.mxu1  ;;  %2931 = vmatprep.subr.bf16.mxu1 %v3903_v3  ;;  %v3913_v17 = vld [vmem:[#allocation7 + $0x488] ss:$16 sps:$4 sm:$0xff]   ;;  %v3984_v48 = vld [vmem:[#allocation7 + $0x30c] ss:$16 sps:$4 sm:$0xff]  }
 0x1f0   :  { %2891 = vmatpush1.bf16.msra.mxu0 %v3898_v32  ;;  %v3973_v25 = vld [vmem:[#allocation7 + $0x548] ss:$16 sps:$4 sm:$0xff]  }
 0x1f1   :  { %2932 = vmatpush1.bf16.msra.mxu1 %v3901_v26  ;;  %v1639_v37 = vpop.f32.mrf.mxu0  ;;  %v1680_v35 = vpop.f32.mrf.mxu1  ;;  %2892 = vmatprep.subr.bf16.mxu0 %v3906_v33  ;;  %v3976_v3 = vld [vmem:[#allocation7 + $0x328] ss:$16 sps:$4 sm:$0xff]   ;;  %v3987_v26 = vld [vmem:[#allocation7 + $0x50c] ss:$16 sps:$4 sm:$0xff]  }
 0x1f2   :  { %2933 = vmatprep.subr.bf16.mxu1 %v3909_v43  ;;  %v3979_v32 = vld [vmem:[#allocation7 + $0x528] ss:$16 sps:$4 sm:$0xff]  }
 0x1f3   :  { %v3982_v33 = vld [vmem:[#allocation7 + $0x308] ss:$16 sps:$4 sm:$0xff]  }
 0x1f4   :  { %2893 = vmatpush1.bf16.msra.mxu0 %v3904_v5  ;;  %v3985_v43 = vld [vmem:[#allocation7 + $0x508] ss:$16 sps:$4 sm:$0xff]  }
 0x1f5   :  { %2934 = vmatpush1.bf16.msra.mxu1 %v3907_v39  ;;  %2894 = vmatprep.subr.bf16.mxu0 %v3912_v6 }
 0x1f6   :  { %2935 = vmatprep.subr.bf16.mxu1 %v3915_v19 }
 0x1f8   :  { %2895 = vmatpush1.bf16.msra.mxu0 %v3910_v8 }
 0x1f9   :  { %2936 = vmatpush1.bf16.msra.mxu1 %v3913_v17  ;;  %2896 = vmatprep.subr.bf16.mxu0 %v3918_v38 }
 0x1fa   :  { %2937 = vmatprep.subr.bf16.mxu1 %v3921_v40 }
 0x1fc   :  { %2897 = vmatpush1.bf16.msra.mxu0 %v3916_v41 }
 0x1fd   :  { %2938 = vmatpush1.bf16.msra.mxu1 %v3919_v42  ;;  %2898 = vmatprep.subr.bf16.mxu0 %v3924_v47 }
 0x1fe   :  { %2939 = vmatprep.subr.bf16.mxu1 %v3927_v10 }
 0x200   :  { %2899 = vmatpush1.bf16.msra.mxu0 %v3922_v49 }
 0x201   :  { %2940 = vmatpush1.bf16.msra.mxu1 %v3925_v50  ;;  %2900 = vmatprep.subr.bf16.mxu0 %v3930_v51  ;;  %v2972_v51 = vlaneseq }
 0x202   :  { %2941 = vmatprep.subr.bf16.mxu1 %v3933_v52 }
 0x204   :  { %2901 = vmatpush1.bf16.msra.mxu0 %v3928_v54 }
 0x205   :  { %2942 = vmatpush1.bf16.msra.mxu1 %v3931_v55  ;;  %2902 = vmatprep.subr.bf16.mxu0 %v3936_v56 }
 0x206   :  { %2943 = vmatprep.subr.bf16.mxu1 %v3939_v57 }
 0x208   :  { %2903 = vmatpush1.bf16.msra.mxu0 %v3934_v58 }
 0x209   :  { %2944 = vmatpush1.bf16.msra.mxu1 %v3937_v59  ;;  %2904 = vmatprep.subr.bf16.mxu0 %v3942_v36 }
 0x20a   :  { %2945 = vmatprep.subr.bf16.mxu1 %v3945_v60 }
 0x20c   :  { %2905 = vmatpush2.bf16.msra.mxu0 %v3940_v61 }
 0x20d   :  { %2946 = vmatpush2.bf16.msra.mxu1 %v3943_v62  ;;  %2906 = vmatprep.subr.bf16.mxu0 %v3948_v63 }
 0x20e   :  { %2947 = vmatprep.subr.bf16.mxu1 %v3951_v0 }
 0x210   :  { %2907 = vmatpush2.bf16.msra.mxu0 %v3946_v46 }
 0x211   :  { %2948 = vmatpush2.bf16.msra.mxu1 %v3949_v1  ;;  %2908 = vmatprep.subr.bf16.mxu0 %v3954_v28 }
 0x212   :  { %2949 = vmatprep.subr.bf16.mxu1 %v3957_v2 }
 0x214   :  { %2909 = vmatpush2.bf16.msra.mxu0 %v3952_v4 }
 0x215   :  { %2950 = vmatpush2.bf16.msra.mxu1 %v3955_v7  ;;  %2910 = vmatprep.subr.bf16.mxu0 %v3960_v9 }
 0x216   :  { %2951 = vmatprep.subr.bf16.mxu1 %v3963_v13 }
 0x218   :  { %2911 = vmatpush2.bf16.msra.mxu0 %v3958_v44 }
 0x219   :  { %2952 = vmatpush2.bf16.msra.mxu1 %v3961_v14  ;;  %2912 = vmatprep.subr.bf16.mxu0 %v3966_v15 }
 0x21a   :  { %2953 = vmatprep.subr.bf16.mxu1 %v3969_v16 }
 0x21c   :  { %2913 = vmatpush2.bf16.msra.mxu0 %v3964_v45 }
 0x21d   :  { %2954 = vmatpush2.bf16.msra.mxu1 %v3967_v18  ;;  %2914 = vmatprep.subr.bf16.mxu0 %v3972_v21 }
 0x21e   :  { %2955 = vmatprep.subr.bf16.mxu1 %v3975_v22 }
 0x220   :  { %2915 = vmatpush2.bf16.msra.mxu0 %v3970_v23 }
 0x221   :  { %2956 = vmatpush2.bf16.msra.mxu1 %v3973_v25  ;;  %2916 = vmatprep.subr.bf16.mxu0 %v3978_v27 }
 0x222   :  { %2957 = vmatprep.subr.bf16.mxu1 %v3981_v29 }
 0x224   :  { %2917 = vmatpush2.bf16.msra.mxu0 %v3976_v3 }
 0x225   :  { %2958 = vmatpush2.bf16.msra.mxu1 %v3979_v32  ;;  %2918 = vmatprep.subr.bf16.mxu0 %v3984_v48 }
 0x226   :  { %2959 = vmatprep.subr.bf16.mxu1 %v3987_v26 }
 0x228   :  { %2919 = vmatpush2.bf16.msra.mxu0 %v3982_v33 }
 0x229   :  { %2960 = vmatpush2.bf16.msra.mxu1 %v3985_v43 }
 0x22b   :  { %v1716_v34 = vpop.f32.mrf.mxu0  ;;  %2921 = vmatmul.mubr.bf16.vlgmr.msra.gmra.mxu0 %v4271_v53 }
 0x22c   :  { %v1717_v20 = vadd.f32 %v1716_v34, %v4289_v30  ;;  %v1757_v5 = vpop.f32.mrf.mxu1  ;;  %2962 = vmatmul.mubr.bf16.vlgmr.msra.gmra.mxu1 %v4287_v24  ;;  %v2973_v24 = vshrl.u32 %v2972_v51, 7 }
 0x22d   :  { %v1718_v37 = vpop.f32.mrf.mxu0 }
 0x22e   :  { %v1758_v35 = vadd.f32 %v1757_v5, %v1717_v20  ;;  %v1719_v39 = vadd.f32 %v1718_v37, %v4297_v12  ;;  %v1759_v6 = vpop.f32.mrf.mxu1  ;;  %v2974_v54 = vsub.s32 0, %v2973_v24  ;;  %v2970_v12 = vld [vmem:[%s4319_s4] sm:$0xf]  ;;  %v2978_v56 = vsub.s32 1, %v2973_v24  ;;  %s4104_s4 = smov [#allocation10]  }
 0x22f   :  { %v1720_v19 = vpop.f32.mrf.mxu0  ;;  %v2982_v13 = vsub.s32 2, %v2973_v24  ;;  %v2986_v14 = vsub.s32 3, %v2973_v24  ;;  %s3010_s13 = sshll.u32 %s4104_s4, 4  ;;  %s3011_s13 = int_to_ptr.vmem [resolvable:$true] %s3010_s13 }
 0x230   :  { %v1760_v8 = vadd.f32 %v1759_v6, %v1719_v39  ;;  %v1761_v17 = vpop.f32.mrf.mxu1  ;;  %v2975_v58 = vrot.slane %v2970_v12, %v2974_v54  ;;  %v2979_v62 = vrot.slane %v2970_v12, %v2978_v56  ;;  %s4070_s14 = scalar_lea.vmem %s3011_s13, 512  ;;  %p4075_p7 = scmp.lt.s32.totalorder %s3011_s13, %s3011_s13 }
 0x231   :  { %v1721_v38 = vpop.f32.mrf.mxu0  ;;  %v2983_v21 = vrot.slane %v2970_v12, %v2982_v13  ;;  %v2987_v29 = vrot.slane %v2970_v12, %v2986_v14  ;;  %p4071_p6 = scmp.ne.s32.totalorder %s3011_s13, %s4070_s14  ;;  %p4076_p8 = scmp.lt.s32.totalorder %s4070_s14, %s4070_s14 }
 0x232   :  { %v1762_v40 = vpop.f32.mrf.mxu1 }
 0x233   :  { %p4077_p9 = por %p4076_p8, %p4075_p7 }
 0x235   :  { %p4078_p10 = pnand %p4077_p9, %p4071_p6 }
 0x26b   :  { %v2758_v41 = vpop.f32.mrf.mxu0 }
 0x26c   :  { %v2799_v42 = vpop.f32.mrf.mxu1  ;;  %v2759_v52 = vadd.f32 %v2758_v41, %v4293_v31 }
 0x26d   :  { %v2760_v47 = vpop.f32.mrf.mxu0 }
 0x26e   :  { %v2801_v10 = vpop.f32.mrf.mxu1  ;;  %v2761_v55 = vadd.f32 %v2760_v47, %v4301_v11  ;;  %v2800_v57 = vadd.f32 %v2799_v42, %v2759_v52 }
 0x26f   :  { %v2762_v53 = vpop.f32.mrf.mxu0 }
 0x270   :  { %v2803_v49 = vpop.f32.mrf.mxu1  ;;  %v2802_v36 = vadd.f32 %v2801_v10, %v2761_v55 }
 0x271   :  { %v2763_v30 = vpop.f32.mrf.mxu0 }
 0x272   :  { %v2804_v50 = vpop.f32.mrf.mxu1 }
 0x2ab   :  { %v2840_v59 = vpop.f32.mrf.mxu0 }
 0x2ac   :  { %v2841_v60 = vadd.f32 %v2840_v59, %v2800_v57  ;;  %v2881_v61 = vpop.f32.mrf.mxu1 }
 0x2ad   :  { %v2842_v63 = vpop.f32.mrf.mxu0  ;;  %v2882_v44 = vadd.f32 %v2881_v61, %v1758_v35 }
 0x2ae   :  { %v2992_v0 = vadd.f32 %v2975_v58, %v2841_v60  ;;  %v2843_v46 = vadd.f32 %v2842_v63, %v2802_v36  ;;  %v2883_v1 = vpop.f32.mrf.mxu1 }
 0x2af   :  { %v2844_v31 = vpop.f32.mrf.mxu0  ;;  %v2884_v16 = vadd.f32 %v2883_v1, %v1760_v8 }
 0x2b0   :  { %v2996_v28 = vmax.f32 %v2992_v0, 0.0  ;;  %v2993_v2 = vadd.f32 %v2979_v62, %v2843_v46  ;;  %v2885_v4 = vpop.f32.mrf.mxu1 }
 0x2b1   :  { %v2845_v7 = vpop.f32.mrf.mxu0 }
 0x2b2   :  { %3000 = vst [vmem:[#allocation10] sm:$0xff] %v2996_v28  ;;  %v2997_v9 = vmax.f32 %v2993_v2, 0.0  ;;  %v2886_v11 = vpop.f32.mrf.mxu1 }
 0x2b4   :  { %3001 = vst [vmem:[#allocation10 + $0x8] sm:$0xff] %v2997_v9 }
 0x2eb   :  { %v2922_v15 = vpop.f32.mrf.mxu0 }
 0x2ec   :  { %v2923_v45 = vadd.f32 %v2922_v15, %v2882_v44  ;;  %v2963_v18 = vpop.f32.mrf.mxu1 }
 0x2ed   :  { %v2924_v22 = vpop.f32.mrf.mxu0 }
 0x2ee   :  { %v2964_v23 = vadd.f32 %v2963_v18, %v2923_v45  ;;  %v2925_v25 = vadd.f32 %v2924_v22, %v2884_v16  ;;  %v2965_v27 = vpop.f32.mrf.mxu1 }
 0x2ef   :  { %v2926_v3 = vpop.f32.mrf.mxu0 }
 0x2f0   :  { %v2994_v32 = vadd.f32 %v2983_v21, %v2964_v23  ;;  %v2966_v48 = vadd.f32 %v2965_v27, %v2925_v25  ;;  %v2967_v26 = vpop.f32.mrf.mxu1 }
 0x2f1   :  { %v2927_v33 = vpop.f32.mrf.mxu0 }
 0x2f2   :  { %v2998_v43 = vmax.f32 %v2994_v32, 0.0  ;;  %v2995_v34 = vadd.f32 %v2987_v29, %v2966_v48  ;;  %v2968_v20 = vpop.f32.mrf.mxu1 }
 0x2f4   :  { %3002 = vst [vmem:[#allocation10 + $0x10] sm:$0xff] %v2998_v43  ;;  %v2999_v5 = vmax.f32 %v2995_v34, 0.0 }
 0x2f6   :  { %3003 = vst [vmem:[#allocation10 + $0x18] sm:$0xff] %v2999_v5 }
 0x2f7   :  { %4081 = shalt.err (!%p4078_p10)
}
 0x2f8   :  { %3013 = dma.vmem_to_hbm [thread:$0]  %s3011_s13, 512, %s4320_s5, [#allocation4]  }
 0x2f9   :  { %4096 = dma.done.wait [#allocation4], 512  }
 0x2fa   :  { %4097 = vsyncadd [#allocation4], 4294966784 }
 0x2fb   :  { %3017 = vsyncpa [#allocation3], 1 }
 0x2fc   :  { %3018 = vsyncpa [#allocation6], 1 }
 0x2fd   :  { %3019 = vsyncpa [#allocation9], 1 }
 0x2fe   :  { %3020 = vsyncpa [#allocation4], 1 }

</bundles_post_ra>
